<compile_context>
chip_gen: v7x
topology: tpu7x:2x2x1
jax: 0.10.0
libtpu: 0.0.40
codegen_flags: <defaults>
</compile_context>

<pallas_src>
import math

import jax
import jax.numpy as jnp
from jax.experimental import pallas as pl
from jax.experimental.pallas import tpu as pltpu

NEG_BIG = -1e30                    # finite masking bias (safer than -inf)
LN_EPS = 1e-5
VMEM_LIMIT_BYTES = 32 * 1024 * 1024


def _full_spec(shape):
    """Whole-array block, resident across the 1-D grid (same block index)."""
    shape = tuple(int(s) for s in shape)
    return pl.BlockSpec(shape, lambda i: (0,) * len(shape))


# ----------------------------------------------------------------------------
# Kernel A: x + SiLU(time proj) + SiLU(pos proj), fused Q/K/V projections.
# Grid: 1-D over token-row tiles ("parallel").
# ----------------------------------------------------------------------------
def make_embed_qkv_kernel(matmul_dtype):
    def _mm(a, w_ref):
        return jnp.dot(a.astype(matmul_dtype), w_ref[...].astype(matmul_dtype),
                       preferred_element_type=jnp.float32)

    def _silu(v):
        return v * jax.nn.sigmoid(v)

    def kernel(x_ref, temb_ref, pemb_ref,
               wt_ref, bt_ref, wp_ref, bp_ref,
               wq_ref, bq_ref, wk_ref, bk_ref, wv_ref, bv_ref,
               h_ref, q_ref, k_ref, v_ref):
        temb = _silu(_mm(temb_ref[...], wt_ref) + bt_ref[...])
        pemb = _silu(_mm(pemb_ref[...], wp_ref) + pp_bias(bp_ref))
        h = x_ref[...] + temb + pemb
        h_ref[...] = h
        h_m = h.astype(matmul_dtype)
        q_ref[...] = jnp.dot(h_m, wq_ref[...].astype(matmul_dtype),
                             preferred_element_type=jnp.float32) + bq_ref[...]
        k_ref[...] = jnp.dot(h_m, wk_ref[...].astype(matmul_dtype),
                             preferred_element_type=jnp.float32) + bk_ref[...]
        v_ref[...] = jnp.dot(h_m, wv_ref[...].astype(matmul_dtype),
                             preferred_element_type=jnp.float32) + bv_ref[...]

    def pp_bias(b_ref):   # tiny helper keeps the body readable
        return b_ref[...]

    return kernel


# ----------------------------------------------------------------------------
# Kernel B: masked MHSA (all heads batched) + out proj + ln1 + MLP + ln2.
# Grid: 1-D over query-row tiles ("parallel"); K/V + weights resident.
# ----------------------------------------------------------------------------
def make_attn_mlp_kernel(n_head, head_dim, matmul_dtype, ln_eps=LN_EPS):
    inv_sqrt_hd = 1.0 / math.sqrt(head_dim)
    inv_sqrt2 = 1.0 / math.sqrt(2.0)

    def _mm(a, w_ref):
        return jnp.dot(a.astype(matmul_dtype), w_ref[...].astype(matmul_dtype),
                       preferred_element_type=jnp.float32)

    def _gelu(v):  # exact (erf) GELU — PyTorch nn.GELU() default
        return 0.5 * v * (1.0 + jax.lax.erf(v * inv_sqrt2))

    def _layernorm(v):  # biased variance, eps=1e-5
        mu = jnp.mean(v, axis=-1, keepdims=True)
        var = jnp.mean(jnp.square(v - mu), axis=-1, keepdims=True)
        return (v - mu) * jax.lax.rsqrt(var + ln_eps)

    def kernel(h_ref, qh_ref, kh_ref, vh_ref, segq_ref, segk_ref,
               wo_ref, bo_ref, w1_ref, b1_ref, w2_ref, b2_ref, w3_ref, b3_ref,
               g2_ref, be2_ref,
               out_ref, att_ref):
        h = h_ref[...]                                   # (tq, D) f32
        qh = qh_ref[...].astype(matmul_dtype)            # (H, tq, hd)
        kh = kh_ref[...].astype(matmul_dtype)            # (H, Np, hd)
        vh = vh_ref[...].astype(matmul_dtype)            # (H, Np, hd)

        # Block-diagonal additive mask from segment ids, built once per tile.
        bias = jnp.where(segq_ref[...] == segk_ref[...],
                         jnp.float32(0.0), jnp.float32(NEG_BIG))   # (tq, Np)

        # All heads at once: batched q·k^T (no transpose materialized).
        s = jnp.einsum('hqd,hkd->hqk', qh, kh,
                       preferred_element_type=jnp.float32) * inv_sqrt_hd
        s = s + bias[None, :, :]
        m = jnp.max(s, axis=-1, keepdims=True)
        e = jnp.exp(s - m)
        denom = jnp.sum(e, axis=-1, keepdims=True)
        p = e * pl.reciprocal(denom, approx=True)        # (H, tq, Np) f32
        att_ref[...] = p

        # p @ v per head (batched), then fused head-merge + output projection:
        # concat_h(y_h) @ Wo == sum_h (y_h @ Wo_h), with Wo pre-reshaped to
        # (H, hd, D) in the wrapper. No concatenate / in-kernel transpose.
        y = jnp.einsum('hqk,hkd->hqd', p.astype(matmul_dtype), vh,
                       preferred_element_type=jnp.float32)           # (H, tq, hd)
        yproj = jnp.einsum('hqd,hdn->hqn', y.astype(matmul_dtype),
                           wo_ref[...].astype(matmul_dtype),
                           preferred_element_type=jnp.float32)        # (H, tq, D)
        a = jnp.sum(yproj, axis=0) + bo_ref[...]

        # residual + ln1 (elementwise_affine=False)
        x1 = _layernorm(h + a)

        # MLP: D -> 4D -> GELU -> 2D -> GELU -> D
        h1 = _gelu(_mm(x1, w1_ref) + b1_ref[...])
        h2 = _gelu(_mm(h1, w2_ref) + b2_ref[...])
        h3 = _mm(h2, w3_ref) + b3_ref[...]

        # residual + ln2 (affine)
        out_ref[...] = _layernorm(x1 + h3) * g2_ref[...] + be2_ref[...]

    return kernel


# ----------------------------------------------------------------------------
# Plain-JAX glue
# ----------------------------------------------------------------------------
def sinusoidal_pos_emb(idx, num_steps, dim, rescale_steps=4000.0):
    # TODO(synk): SinusoidalPosEmb class source was not provided; standard
    # rescaled sin||cos diffusion embedding assumed.
    t = idx.astype(jnp.float32) / float(num_steps) * rescale_steps
    half = dim // 2
    freqs = jnp.exp(jnp.arange(half, dtype=jnp.float32)
                    * -(math.log(10000.0) / (half - 1)))
    args = t[:, None] * freqs[None, :]
    return jnp.concatenate([jnp.sin(args), jnp.cos(args)], axis=-1)


def _prep_inputs(time_step, batch, num_seqs, n_emb, n_diff_step, n_seq_max):
    n_tok = batch.shape[0]
    temb_raw = sinusoidal_pos_emb(time_step, n_diff_step, n_emb)
    lengths = jnp.bincount(batch, length=num_seqs)
    offsets = jnp.concatenate(
        [jnp.zeros((1,), lengths.dtype), jnp.cumsum(lengths)[:-1]])
    pos = jnp.arange(n_tok, dtype=jnp.int32) - offsets[batch].astype(jnp.int32)
    pemb_raw = sinusoidal_pos_emb(pos, n_seq_max, n_emb)
    return temb_raw, pemb_raw


def _choose_row_tile(n_tok, requested):
    if requested is not None:
        return int(requested)
    if n_tok >= 256:
        return 256
    return max(8, -(-n_tok // 8) * 8)   # single padded tile for tiny inputs


def seq_block_forward(x, time_step, batch, *, num_seqs, n_head,
                      n_diff_step, n_seq_max, params,
                      matmul_dtype=jnp.float32, row_tile=None):
    n_tok, n_emb = x.shape
    head_dim = n_emb // n_head
    p = params

    temb_raw, pemb_raw = _prep_inputs(
        time_step, batch, num_seqs, n_emb, n_diff_step, n_seq_max)

    # --- pad token dimension to a multiple of the row tile ------------------
    tile = _choose_row_tile(n_tok, row_tile)
    n_pad_tok = -(-n_tok // tile) * tile
    pad = n_pad_tok - n_tok
    x_p = jnp.pad(x, ((0, pad), (0, 0)))
    temb_p = jnp.pad(temb_raw, ((0, pad), (0, 0)))
    pemb_p = jnp.pad(pemb_raw, ((0, pad), (0, 0)))
    seg = jnp.pad(batch.astype(jnp.int32), (0, pad), constant_values=-1)
    seg_col = seg.reshape(n_pad_tok, 1)     # query-side segment ids
    seg_row = seg.reshape(1, n_pad_tok)     # key-side segment ids

    grid = (n_pad_tok // tile,)
    row_spec = pl.BlockSpec((tile, n_emb), lambda i: (i, 0))
    cparams = pltpu.CompilerParams(
        dimension_semantics=("parallel",),
        vmem_limit_bytes=VMEM_LIMIT_BYTES)

    md = matmul_dtype
    # matrix weights in matmul dtype (bf16 halves HBM/VMEM weight traffic on
    # v6e/v7x); biases / LN affine stay f32.
    wt, wp = p['wt'].astype(md), p['wp'].astype(md)
    wq, wk, wv = p['wq'].astype(md), p['wk'].astype(md), p['wv'].astype(md)
    wo_r = p['wo'].reshape(n_head, head_dim, n_emb).astype(md)
    w1, w2, w3 = p['w1'].astype(md), p['w2'].astype(md), p['w3'].astype(md)

    # --- kernel A: embeddings + QKV (row-parallel) ---------------------------
    ops_a = (x_p, temb_p, pemb_p,
             wt, p['bt'], wp, p['bp'],
             wq, p['bq'], wk, p['bk'], wv, p['bv'])
    h, q, k, v = pl.pallas_call(
        make_embed_qkv_kernel(md),
        grid=grid,
        in_specs=[row_spec, row_spec, row_spec]
                 + [_full_spec(a.shape) for a in ops_a[3:]],
        out_specs=(row_spec, row_spec, row_spec, row_spec),
        out_shape=tuple(jax.ShapeDtypeStruct((n_pad_tok, n_emb), jnp.float32)
                        for _ in range(4)),
        compiler_params=cparams,
    )(*ops_a)

    # head split is wrapper-side layout plumbing (kept out of the kernel)
    def to_heads(t):
        return t.reshape(n_pad_tok, n_head, head_dim).transpose(1, 0, 2)
    qh, kh, vh = to_heads(q), to_heads(k), to_heads(v)

    # --- kernel B: attention + MLP (query-row-parallel) ----------------------
    q_spec = pl.BlockSpec((n_head, tile, head_dim), lambda i: (0, i, 0))
    kv_spec = _full_spec((n_head, n_pad_tok, head_dim))
    segq_spec = pl.BlockSpec((tile, 1), lambda i: (i, 0))
    segk_spec = _full_spec((1, n_pad_tok))
    att_spec = pl.BlockSpec((n_head, tile, n_pad_tok), lambda i: (0, i, 0))

    ops_b = (h, qh, kh, vh, seg_col, seg_row,
             wo_r, p['bo'], w1, p['b1'], w2, p['b2'], w3, p['b3'],
             p['g2'], p['be2'])
    out_p, att_p = pl.pallas_call(
        make_attn_mlp_kernel(n_head, head_dim, md),
        grid=grid,
        in_specs=[row_spec, q_spec, kv_spec, kv_spec, segq_spec, segk_spec]
                 + [_full_spec(a.shape) for a in ops_b[6:]],
        out_specs=(row_spec, att_spec),
        out_shape=(jax.ShapeDtypeStruct((n_pad_tok, n_emb), jnp.float32),
                   jax.ShapeDtypeStruct((n_head, n_pad_tok, n_pad_tok),
                                        jnp.float32)),
        compiler_params=cparams,
    )(*ops_b)

    return out_p[:n_tok], att_p[:, :n_tok, :n_tok]


# ----------------------------------------------------------------------------
# Pure-JAX reference (same math, no Pallas) — used only for a sanity check
# ----------------------------------------------------------------------------
def seq_block_reference(x, time_step, batch, *, num_seqs, n_head,
                        n_diff_step, n_seq_max, params):
    p = params
    n_tok, n_emb = x.shape
    hd = n_emb // n_head
    temb_raw, pemb_raw = _prep_inputs(
        time_step, batch, num_seqs, n_emb, n_diff_step, n_seq_max)
    mask = batch[:, None] == batch[None, :]

    silu = lambda v: v * jax.nn.sigmoid(v)
    gelu = lambda v: 0.5 * v * (1.0 + jax.lax.erf(v / math.sqrt(2.0)))

    def ln(v):
        mu = v.mean(-1, keepdims=True)
        var = jnp.square(v - mu).mean(-1, keepdims=True)
        return (v - mu) * jax.lax.rsqrt(var + LN_EPS)

    x = x + silu(temb_raw @ p['wt'] + p['bt']) + silu(pemb_raw @ p['wp'] + p['bp'])
    q = x @ p['wq'] + p['bq']
    k = x @ p['wk'] + p['bk']
    v = x @ p['wv'] + p['bv']
    qh = q.reshape(n_tok, n_head, hd).transpose(1, 0, 2)
    kh = k.reshape(n_tok, n_head, hd).transpose(1, 0, 2)
    vh = v.reshape(n_tok, n_head, hd).transpose(1, 0, 2)
    s = jnp.einsum('hnd,hmd->hnm', qh, kh) / math.sqrt(hd)
    s = jnp.where(mask[None], s, -jnp.inf)
    att = jax.nn.softmax(s, axis=-1)
    y = jnp.einsum('hnm,hmd->hnd', att, vh).transpose(1, 0, 2).reshape(n_tok, n_emb)
    a = y @ p['wo'] + p['bo']

    x = ln(x + a)
    h1 = gelu(x @ p['w1'] + p['b1'])
    h2 = gelu(h1 @ p['w2'] + p['b2'])
    h3 = h2 @ p['w3'] + p['b3']
    x = ln(x + h3) * p['g2'] + p['be2']
    return x, att


# ----------------------------------------------------------------------------
# Deterministic parameter init (PyTorch-Linear-style uniform fan-in bounds)
# ----------------------------------------------------------------------------
def init_params(key, d):
    def lin(k, din, dout):
        k1, k2 = jax.random.split(k)
        bound = 1.0 / math.sqrt(din)
        w = jax.random.uniform(k1, (din, dout), jnp.float32, -bound, bound)
        b = jax.random.uniform(k2, (1, dout), jnp.float32, -bound, bound)
        return w, b

    keys = jax.random.split(key, 9)
    p = {}
    p['wt'], p['bt'] = lin(keys[0], d, d)          # linear_t
    p['wp'], p['bp'] = lin(keys[1], d, d)          # linear_pos
    p['wq'], p['bq'] = lin(keys[2], d, d)          # attn query
    p['wk'], p['bk'] = lin(keys[3], d, d)          # attn key
    p['wv'], p['bv'] = lin(keys[4], d, d)          # attn value
    p['wo'], p['bo'] = lin(keys[5], d, d)          # attn output proj
    p['w1'], p['b1'] = lin(keys[6], d, 4 * d)      # mlp fc1
    p['w2'], p['b2'] = lin(keys[7], 4 * d, 2 * d)  # mlp fc2
    p['w3'], p['b3'] = lin(keys[8], 2 * d, d)      # mlp fc3
    p['g2'] = jnp.ones((1, d), jnp.float32)        # ln2 weight (PyTorch init)
    p['be2'] = jnp.zeros((1, d), jnp.float32)      # ln2 bias
    return p


# ----------------------------------------------------------------------------
if __name__ == "__main__":
    jax.config.update("jax_default_matmul_precision", "highest")

    n_emb, n_head = 32, 4
    n_diff_step, n_seq_max = 100, 64
    seq_lengths = [8, 8]                      # two sequences, 16 tokens total
    n_tok = sum(seq_lengths)

    batch = jnp.concatenate(
        [jnp.full((l,), i, jnp.int32) for i, l in enumerate(seq_lengths)])
    t_per_seq = jnp.array([5, 17], jnp.int32)  # diffusion step per sequence
    time_step = t_per_seq[batch]               # per-token time index

    key = jax.random.PRNGKey(0)
    kx, kp = jax.random.split(key)
    x = jax.random.normal(kx, (n_tok, n_emb), jnp.float32)
    params = init_params(kp, n_emb)

    # f32 path with an explicit 2-step row grid (exercises tiling/pipelining)
    out, att = seq_block_forward(
        x, time_step, batch, num_seqs=len(seq_lengths), n_head=n_head,
        n_diff_step=n_diff_step, n_seq_max=n_seq_max, params=params,
        matmul_dtype=jnp.float32, row_tile=8)
    jax.block_until_ready((out, att))

    ref_out, ref_att = seq_block_reference(
        x, time_step, batch, num_seqs=len(seq_lengths), n_head=n_head,
        n_diff_step=n_diff_step, n_seq_max=n_seq_max, params=params)

    assert out.shape == (n_tok, n_emb) and att.shape == (n_head, n_tok, n_tok)
    assert jnp.allclose(out, ref_out, atol=1e-2, rtol=1e-2)
    assert jnp.allclose(att, ref_att, atol=1e-2, rtol=1e-2)

    # bf16 MXU path (recommended on v6e/v7x): verify it compiles and runs.
    out_bf, att_bf = seq_block_forward(
        x, time_step, batch, num_seqs=len(seq_lengths), n_head=n_head,
        n_diff_step=n_diff_step, n_seq_max=n_seq_max, params=params,
        matmul_dtype=jnp.bfloat16, row_tile=8)
    jax.block_until_ready((out_bf, att_bf))
    assert bool(jnp.all(jnp.isfinite(out_bf)))
    assert bool(jnp.all(jnp.isfinite(att_bf)))

    print("KERNEL_OK")
</pallas_src>

<mosaic_0001>
module attributes {stable_mosaic.version = 11 : i64} {
  func.func @kernel(%arg0: i32, %arg1: memref<8x32xf32, #tpu.memory_space<vmem>>, %arg2: memref<8x32xf32, #tpu.memory_space<vmem>>, %arg3: memref<8x32xf32, #tpu.memory_space<vmem>>, %arg4: memref<32x32xf32, #tpu.memory_space<vmem>>, %arg5: memref<1x32xf32, #tpu.memory_space<vmem>>, %arg6: memref<32x32xf32, #tpu.memory_space<vmem>>, %arg7: memref<1x32xf32, #tpu.memory_space<vmem>>, %arg8: memref<32x32xf32, #tpu.memory_space<vmem>>, %arg9: memref<1x32xf32, #tpu.memory_space<vmem>>, %arg10: memref<32x32xf32, #tpu.memory_space<vmem>>, %arg11: memref<1x32xf32, #tpu.memory_space<vmem>>, %arg12: memref<32x32xf32, #tpu.memory_space<vmem>>, %arg13: memref<1x32xf32, #tpu.memory_space<vmem>>, %arg14: memref<8x32xf32, #tpu.memory_space<vmem>>, %arg15: memref<8x32xf32, #tpu.memory_space<vmem>>, %arg16: memref<8x32xf32, #tpu.memory_space<vmem>>, %arg17: memref<8x32xf32, #tpu.memory_space<vmem>>) attributes {dimension_semantics = [#tpu.dimension_semantics<parallel>], iteration_bounds = array<i64: 2>, scalar_prefetch = 0 : i64, scratch_operands = 0 : i64, tpu.core_type = #tpu.core_type<tc>, window_params = [{transform_indices = @transform_0, window_bounds = array<i64: 8, 32>}, {transform_indices = @transform_1, window_bounds = array<i64: 8, 32>}, {transform_indices = @transform_2, window_bounds = array<i64: 8, 32>}, {pipeline_mode = #tpu.pipeline_mode<synchronous>, transform_indices = @transform_3, window_bounds = array<i64: 32, 32>}, {pipeline_mode = #tpu.pipeline_mode<synchronous>, transform_indices = @transform_4, window_bounds = array<i64: 1, 32>}, {pipeline_mode = #tpu.pipeline_mode<synchronous>, transform_indices = @transform_5, window_bounds = array<i64: 32, 32>}, {pipeline_mode = #tpu.pipeline_mode<synchronous>, transform_indices = @transform_6, window_bounds = array<i64: 1, 32>}, {pipeline_mode = #tpu.pipeline_mode<synchronous>, transform_indices = @transform_7, window_bounds = array<i64: 32, 32>}, {pipeline_mode = #tpu.pipeline_mode<synchronous>, transform_indices = @transform_8, window_bounds = array<i64: 1, 32>}, {pipeline_mode = #tpu.pipeline_mode<synchronous>, transform_indices = @transform_9, window_bounds = array<i64: 32, 32>}, {pipeline_mode = #tpu.pipeline_mode<synchronous>, transform_indices = @transform_10, window_bounds = array<i64: 1, 32>}, {pipeline_mode = #tpu.pipeline_mode<synchronous>, transform_indices = @transform_11, window_bounds = array<i64: 32, 32>}, {pipeline_mode = #tpu.pipeline_mode<synchronous>, transform_indices = @transform_12, window_bounds = array<i64: 1, 32>}, {transform_indices = @transform_13, window_bounds = array<i64: 8, 32>}, {transform_indices = @transform_14, window_bounds = array<i64: 8, 32>}, {transform_indices = @transform_15, window_bounds = array<i64: 8, 32>}, {transform_indices = @transform_16, window_bounds = array<i64: 8, 32>}]} {
    %c0 = arith.constant 0 : index
    %c0_0 = arith.constant 0 : index
    %0 = vector.load %arg2[%c0, %c0_0] : memref<8x32xf32, #tpu.memory_space<vmem>>, vector<8x32xf32>
    %c0_1 = arith.constant 0 : index
    %c0_2 = arith.constant 0 : index
    %1 = vector.load %arg4[%c0_1, %c0_2] : memref<32x32xf32, #tpu.memory_space<vmem>>, vector<32x32xf32>
    %cst = arith.constant dense<0.000000e+00> : vector<8x32xf32>
    %2 = tpu.matmul %0, %1, %cst {dimension_numbers = #tpu.dot_dimension_numbers<[1], [0], [0], [1], [0, 0, 1, 1], [], []>, precision = #tpu.contract_precision<fp32>} : vector<8x32xf32>, vector<32x32xf32>, vector<8x32xf32> -> vector<8x32xf32>
    %c0_3 = arith.constant 0 : index
    %c0_4 = arith.constant 0 : index
    %3 = vector.load %arg5[%c0_3, %c0_4] : memref<1x32xf32, #tpu.memory_space<vmem>>, vector<1x32xf32>
    %4 = vector.broadcast %3 : vector<1x32xf32> to vector<8x32xf32>
    %5 = arith.addf %2, %4 : vector<8x32xf32>
    %6 = arith.negf %5 : vector<8x32xf32>
    %7 = math.exp %6 : vector<8x32xf32>
    %cst_5 = arith.constant 1.000000e+00 : f32
    %8 = vector.broadcast %cst_5 : f32 to vector<8x32xf32>
    %9 = arith.addf %8, %7 : vector<8x32xf32>
    %10 = arith.divf %8, %9 : vector<8x32xf32>
    %11 = arith.mulf %5, %10 : vector<8x32xf32>
    %c0_6 = arith.constant 0 : index
    %c0_7 = arith.constant 0 : index
    %12 = vector.load %arg3[%c0_6, %c0_7] : memref<8x32xf32, #tpu.memory_space<vmem>>, vector<8x32xf32>
    %c0_8 = arith.constant 0 : index
    %c0_9 = arith.constant 0 : index
    %13 = vector.load %arg6[%c0_8, %c0_9] : memref<32x32xf32, #tpu.memory_space<vmem>>, vector<32x32xf32>
    %cst_10 = arith.constant dense<0.000000e+00> : vector<8x32xf32>
    %14 = tpu.matmul %12, %13, %cst_10 {dimension_numbers = #tpu.dot_dimension_numbers<[1], [0], [0], [1], [0, 0, 1, 1], [], []>, precision = #tpu.contract_precision<fp32>} : vector<8x32xf32>, vector<32x32xf32>, vector<8x32xf32> -> vector<8x32xf32>
    %c0_11 = arith.constant 0 : index
    %c0_12 = arith.constant 0 : index
    %15 = vector.load %arg7[%c0_11, %c0_12] : memref<1x32xf32, #tpu.memory_space<vmem>>, vector<1x32xf32>
    %16 = vector.broadcast %15 : vector<1x32xf32> to vector<8x32xf32>
    %17 = arith.addf %14, %16 : vector<8x32xf32>
    %18 = arith.negf %17 : vector<8x32xf32>
    %19 = math.exp %18 : vector<8x32xf32>
    %cst_13 = arith.constant 1.000000e+00 : f32
    %20 = vector.broadcast %cst_13 : f32 to vector<8x32xf32>
    %21 = arith.addf %20, %19 : vector<8x32xf32>
    %22 = arith.divf %20, %21 : vector<8x32xf32>
    %23 = arith.mulf %17, %22 : vector<8x32xf32>
    %c0_14 = arith.constant 0 : index
    %c0_15 = arith.constant 0 : index
    %24 = vector.load %arg1[%c0_14, %c0_15] : memref<8x32xf32, #tpu.memory_space<vmem>>, vector<8x32xf32>
    %25 = arith.addf %24, %11 : vector<8x32xf32>
    %26 = arith.addf %25, %23 : vector<8x32xf32>
    %c0_16 = arith.constant 0 : index
    %c0_17 = arith.constant 0 : index
    %27 = vector.load %arg14[%c0_16, %c0_17] : memref<8x32xf32, #tpu.memory_space<vmem>>, vector<8x32xf32>
    tpu.vector_store %arg14[%c0_16, %c0_17], %26 {strides = array<i32>} : memref<8x32xf32, #tpu.memory_space<vmem>>, vector<8x32xf32>,
    %c0_18 = arith.constant 0 : index
    %c0_19 = arith.constant 0 : index
    %28 = vector.load %arg8[%c0_18, %c0_19] : memref<32x32xf32, #tpu.memory_space<vmem>>, vector<32x32xf32>
    %cst_20 = arith.constant dense<0.000000e+00> : vector<8x32xf32>
    %29 = tpu.matmul %26, %28, %cst_20 {dimension_numbers = #tpu.dot_dimension_numbers<[1], [0], [0], [1], [0, 0, 1, 1], [], []>, precision = #tpu.contract_precision<fp32>} : vector<8x32xf32>, vector<32x32xf32>, vector<8x32xf32> -> vector<8x32xf32>
    %c0_21 = arith.constant 0 : index
    %c0_22 = arith.constant 0 : index
    %30 = vector.load %arg9[%c0_21, %c0_22] : memref<1x32xf32, #tpu.memory_space<vmem>>, vector<1x32xf32>
    %31 = vector.broadcast %30 : vector<1x32xf32> to vector<8x32xf32>
    %32 = arith.addf %29, %31 : vector<8x32xf32>
    %c0_23 = arith.constant 0 : index
    %c0_24 = arith.constant 0 : index
    %33 = vector.load %arg15[%c0_23, %c0_24] : memref<8x32xf32, #tpu.memory_space<vmem>>, vector<8x32xf32>
    tpu.vector_store %arg15[%c0_23, %c0_24], %32 {strides = array<i32>} : memref<8x32xf32, #tpu.memory_space<vmem>>, vector<8x32xf32>,
    %c0_25 = arith.constant 0 : index
    %c0_26 = arith.constant 0 : index
    %34 = vector.load %arg10[%c0_25, %c0_26] : memref<32x32xf32, #tpu.memory_space<vmem>>, vector<32x32xf32>
    %cst_27 = arith.constant dense<0.000000e+00> : vector<8x32xf32>
    %35 = tpu.matmul %26, %34, %cst_27 {dimension_numbers = #tpu.dot_dimension_numbers<[1], [0], [0], [1], [0, 0, 1, 1], [], []>, precision = #tpu.contract_precision<fp32>} : vector<8x32xf32>, vector<32x32xf32>, vector<8x32xf32> -> vector<8x32xf32>
    %c0_28 = arith.constant 0 : index
    %c0_29 = arith.constant 0 : index
    %36 = vector.load %arg11[%c0_28, %c0_29] : memref<1x32xf32, #tpu.memory_space<vmem>>, vector<1x32xf32>
    %37 = vector.broadcast %36 : vector<1x32xf32> to vector<8x32xf32>
    %38 = arith.addf %35, %37 : vector<8x32xf32>
    %c0_30 = arith.constant 0 : index
    %c0_31 = arith.constant 0 : index
    %39 = vector.load %arg16[%c0_30, %c0_31] : memref<8x32xf32, #tpu.memory_space<vmem>>, vector<8x32xf32>
    tpu.vector_store %arg16[%c0_30, %c0_31], %38 {strides = array<i32>} : memref<8x32xf32, #tpu.memory_space<vmem>>, vector<8x32xf32>,
    %c0_32 = arith.constant 0 : index
    %c0_33 = arith.constant 0 : index
    %40 = vector.load %arg12[%c0_32, %c0_33] : memref<32x32xf32, #tpu.memory_space<vmem>>, vector<32x32xf32>
    %cst_34 = arith.constant dense<0.000000e+00> : vector<8x32xf32>
    %41 = tpu.matmul %26, %40, %cst_34 {dimension_numbers = #tpu.dot_dimension_numbers<[1], [0], [0], [1], [0, 0, 1, 1], [], []>, precision = #tpu.contract_precision<fp32>} : vector<8x32xf32>, vector<32x32xf32>, vector<8x32xf32> -> vector<8x32xf32>
    %c0_35 = arith.constant 0 : index
    %c0_36 = arith.constant 0 : index
    %42 = vector.load %arg13[%c0_35, %c0_36] : memref<1x32xf32, #tpu.memory_space<vmem>>, vector<1x32xf32>
    %43 = vector.broadcast %42 : vector<1x32xf32> to vector<8x32xf32>
    %44 = arith.addf %41, %43 : vector<8x32xf32>
    %c0_37 = arith.constant 0 : index
    %c0_38 = arith.constant 0 : index
    %45 = vector.load %arg17[%c0_37, %c0_38] : memref<8x32xf32, #tpu.memory_space<vmem>>, vector<8x32xf32>
    tpu.vector_store %arg17[%c0_37, %c0_38], %44 {strides = array<i32>} : memref<8x32xf32, #tpu.memory_space<vmem>>, vector<8x32xf32>,
    return
  }
  func.func @transform_0(%arg0: i32) -> (i32, i32) {
    %c0_i32 = arith.constant 0 : i32
    %c0_i32_0 = arith.constant 0 : i32
    return %arg0, %c0_i32 : i32, i32
  }
  func.func @transform_1(%arg0: i32) -> (i32, i32) {
    %c0_i32 = arith.constant 0 : i32
    %c0_i32_0 = arith.constant 0 : i32
    return %arg0, %c0_i32 : i32, i32
  }
  func.func @transform_2(%arg0: i32) -> (i32, i32) {
    %c0_i32 = arith.constant 0 : i32
    %c0_i32_0 = arith.constant 0 : i32
    return %arg0, %c0_i32 : i32, i32
  }
  func.func @transform_3(%arg0: i32) -> (i32, i32) {
    %c0_i32 = arith.constant 0 : i32
    %c0_i32_0 = arith.constant 0 : i32
    %c0_i32_1 = arith.constant 0 : i32
    return %c0_i32, %c0_i32_0 : i32, i32
  }
  func.func @transform_4(%arg0: i32) -> (i32, i32) {
    %c0_i32 = arith.constant 0 : i32
    %c0_i32_0 = arith.constant 0 : i32
    %c0_i32_1 = arith.constant 0 : i32
    return %c0_i32, %c0_i32_0 : i32, i32
  }
  func.func @transform_5(%arg0: i32) -> (i32, i32) {
    %c0_i32 = arith.constant 0 : i32
    %c0_i32_0 = arith.constant 0 : i32
    %c0_i32_1 = arith.constant 0 : i32
    return %c0_i32, %c0_i32_0 : i32, i32
  }
  func.func @transform_6(%arg0: i32) -> (i32, i32) {
    %c0_i32 = arith.constant 0 : i32
    %c0_i32_0 = arith.constant 0 : i32
    %c0_i32_1 = arith.constant 0 : i32
    return %c0_i32, %c0_i32_0 : i32, i32
  }
  func.func @transform_7(%arg0: i32) -> (i32, i32) {
    %c0_i32 = arith.constant 0 : i32
    %c0_i32_0 = arith.constant 0 : i32
    %c0_i32_1 = arith.constant 0 : i32
    return %c0_i32, %c0_i32_0 : i32, i32
  }
  func.func @transform_8(%arg0: i32) -> (i32, i32) {
    %c0_i32 = arith.constant 0 : i32
    %c0_i32_0 = arith.constant 0 : i32
    %c0_i32_1 = arith.constant 0 : i32
    return %c0_i32, %c0_i32_0 : i32, i32
  }
  func.func @transform_9(%arg0: i32) -> (i32, i32) {
    %c0_i32 = arith.constant 0 : i32
    %c0_i32_0 = arith.constant 0 : i32
    %c0_i32_1 = arith.constant 0 : i32
    return %c0_i32, %c0_i32_0 : i32, i32
  }
  func.func @transform_10(%arg0: i32) -> (i32, i32) {
    %c0_i32 = arith.constant 0 : i32
    %c0_i32_0 = arith.constant 0 : i32
    %c0_i32_1 = arith.constant 0 : i32
    return %c0_i32, %c0_i32_0 : i32, i32
  }
  func.func @transform_11(%arg0: i32) -> (i32, i32) {
    %c0_i32 = arith.constant 0 : i32
    %c0_i32_0 = arith.constant 0 : i32
    %c0_i32_1 = arith.constant 0 : i32
    return %c0_i32, %c0_i32_0 : i32, i32
  }
  func.func @transform_12(%arg0: i32) -> (i32, i32) {
    %c0_i32 = arith.constant 0 : i32
    %c0_i32_0 = arith.constant 0 : i32
    %c0_i32_1 = arith.constant 0 : i32
    return %c0_i32, %c0_i32_0 : i32, i32
  }
  func.func @transform_13(%arg0: i32) -> (i32, i32) {
    %c0_i32 = arith.constant 0 : i32
    %c0_i32_0 = arith.constant 0 : i32
    return %arg0, %c0_i32 : i32, i32
  }
  func.func @transform_14(%arg0: i32) -> (i32, i32) {
    %c0_i32 = arith.constant 0 : i32
    %c0_i32_0 = arith.constant 0 : i32
    return %arg0, %c0_i32 : i32, i32
  }
  func.func @transform_15(%arg0: i32) -> (i32, i32) {
    %c0_i32 = arith.constant 0 : i32
    %c0_i32_0 = arith.constant 0 : i32
    return %arg0, %c0_i32 : i32, i32
  }
  func.func @transform_16(%arg0: i32) -> (i32, i32) {
    %c0_i32 = arith.constant 0 : i32
    %c0_i32_0 = arith.constant 0 : i32
    return %arg0, %c0_i32 : i32, i32
  }
}

</mosaic_0001>

<bundles_post_ra>
// kernel: tpu_custom_call.1
= control target key start
LH: loop header
LB: loop body
LE: loop exit
PB: predicated region body
PF: predicated region fallthrough
CT: control target
= control target key end

     0   :  { %s5742_s0 = inlined_call_operand.hbm [shape: f32[16,32], index: 0, kind: input, shape index: {}]   ;;  %s5743_s1 = inlined_call_operand.hbm [shape: f32[16,32], index: 1, kind: input, shape index: {}]   ;;  %s5744_s2 = inlined_call_operand.hbm [shape: f32[16,32], index: 2, kind: input, shape index: {}]   ;;  %s5745_s3 = inlined_call_operand.hbm [shape: f32[32,32], index: 3, kind: input, shape index: {}]   ;;  %s5746_s4 = inlined_call_operand.vmem [shape: f32[1,32], index: 4, kind: input, shape index: {}]   ;;  %s5747_s5 = inlined_call_operand.hbm [shape: f32[32,32], index: 5, kind: input, shape index: {}]   ;;  %s5748_s6 = inlined_call_operand.vmem [shape: f32[1,32], index: 6, kind: input, shape index: {}]   ;;  %s5749_s7 = inlined_call_operand.hbm [shape: f32[32,32], index: 7, kind: input, shape index: {}]   ;;  %s5750_s8 = inlined_call_operand.hbm [shape: f32[1,32], index: 8, kind: input, shape index: {}]   ;;  %s5751_s9 = inlined_call_operand.vmem [shape: f32[32,32], index: 9, kind: input, shape index: {}]   ;;  %s5752_s10 = inlined_call_operand.vmem [shape: f32[1,32], index: 10, kind: input, shape index: {}]   ;;  %s5753_s11 = inlined_call_operand.hbm [shape: f32[32,32], index: 11, kind: input, shape index: {}]   ;;  %s5754_s12 = inlined_call_operand.vmem [shape: f32[1,32], index: 12, kind: input, shape index: {}]   ;;  %s5755_s13 = inlined_call_operand.hbm [shape: f32[16,32], index: 13, kind: output, shape index: {0}]   ;;  %s5756_s14 = inlined_call_operand.hbm [shape: f32[16,32], index: 14, kind: output, shape index: {1}]   ;;  %s5757_s15 = inlined_call_operand.hbm [shape: f32[16,32], index: 15, kind: output, shape index: {2}]   ;;  %s5758_s16 = inlined_call_operand.hbm [shape: f32[16,32], index: 16, kind: output, shape index: {3}]  }
   0x1   :  { %5791 = sst [smem:[#allocation36_spill]] %s5742_s0 }
   0x2   :  { %5792 = sst [smem:[#allocation37_spill]] %s5743_s1 }
   0x3   :  { %5793 = sst [smem:[#allocation38_spill]] %s5745_s3 }
   0x4   :  { %5794 = sst [smem:[#allocation39_spill]] %s5746_s4 }
   0x5   :  { %5795 = sst [smem:[#allocation40_spill]] %s5748_s6 }
   0x6   :  { %5796 = sst [smem:[#allocation41_spill]] %s5749_s7 }
   0x7   :  { %5797 = sst [smem:[#allocation42_spill]] %s5751_s9 }
   0x8   :  { %5798 = sst [smem:[#allocation43_spill]] %s5752_s10 }
   0x9   :  { %5799 = sst [smem:[#allocation44_spill]] %s5754_s12 }
   0xa   :  { %5800 = sst [smem:[#allocation45_spill]] %s5755_s13 }
   0xb   :  { %5801 = sst [smem:[#allocation46_spill]] %s5756_s14 }
   0xc   :  { %5802 = sst [smem:[#allocation47_spill]] %s5757_s15 }
   0xd   :  { %5803 = sst [smem:[#allocation48_spill]] %s5758_s16 }
   0xe   :  { %22 = vsyncpa [#allocation3], 0 }
   0xf   :  { %24 = vsyncpa [#allocation3 + $0x1], 0 }
  0x10   :  { %25 = vsyncpa [#allocation6], 0 }
  0x11   :  { %27 = vsyncpa [#allocation6 + $0x1], 0 }
  0x12   :  { %28 = vsyncpa [#allocation9], 0 }
  0x13   :  { %29 = vsyncpa [#allocation12], 0 }
  0x14   :  { %30 = vsyncpa [#allocation15], 0 }
  0x15   :  { %31 = vsyncpa [#allocation4], 0 }
  0x16   :  { %33 = vsyncpa [#allocation4 + $0x1], 0 }
  0x17   :  { %34 = vsyncpa [#allocation18], 0 }
  0x18   :  { %36 = vsyncpa [#allocation18 + $0x1], 0 }
  0x19   :  { %37 = vsyncpa [#allocation21], 0 }
  0x1a   :  { %39 = vsyncpa [#allocation21 + $0x1], 0  ;;  %s4943_s21 = smov 0   ;;  %s4945_s22 = smov 0  }
  0x1b   :  { %s4947_s23 = smov 0   ;;  %s4949_s24 = smov 0  }
  0x1c LB: > { %5804 = sst [smem:[#allocation30_spill]] %s4827_s21  ;;  %s4841_s25 = smov [#allocation8]   ;;  %s4839_s24 = sphi %s4949_s24, %s5855_s24   ;;  %s4835_s23 = sphi %s4947_s23, %s5859_s23   ;;  %s4831_s22 = sphi %s4945_s22, %s5858_s22   ;;  %s4827_s21 = sphi %s4943_s21, %s5857_s21  }
  0x1d   : > { %5805 = sst [smem:[#allocation31_spill]] %s4839_s24  ;;  %s454_s26 = sshll.u32 %s4841_s25, 4  ;;  %s4969_s26 = int_to_ptr.vmem [resolvable:$true] %s454_s26 }
  0x1e   : > { %s4964_s27 = sadd.s32 4294967295, %s4839_s24   ;;  %p3543_p0 = scmp.ge.s32.totalorder %s4839_s24, 1 }
  0x1f   : > { %p5777_p1 = scmp.eq.s32.totalorder %s4964_s27, 0  ;;  %p442_p2 = scmp.lt.s32.totalorder %s4839_s24, 3 }
  0x20   : > { %s4842_s29 = smov [#allocation11]   ;;  %s5808_s3 = sld [smem:[#allocation38_spill]] }
  0x21   : > { %p4971_p3 = pnand %p3543_p0, %p442_p2  ;;  %s486_s30 = sshll.u32 %s4842_s29, 4  ;;  %s4984_s30 = int_to_ptr.vmem [resolvable:$true] %s486_s30 }
  0x23   : > { %s5806_s28 = scalar_select %p4971_p3, 1, 0 }
  0x24   : > { %p4334_p5 = pneg %p4971_p3 }
  0x26   : > { %p4980_p6 = pnand %p4334_p5, %p5777_p1  ;;  %s4435_s19 = scalar_lea.hbm %s5808_s3, 512 }
  0x27   : > { %p4436_p7 = scmp.ne.s32.totalorder %s5808_s3, %s4435_s19  ;;  %p4442_p11 = scmp.lt.u32.totalorder %s4435_s19, %s5808_s3 }
  0x28   : > { %s5807_s0 = scalar_select %p4980_p6, 1, 0 }
  0x29   : > { %p4994_p8 = pneg %p4980_p6 }
  0x2b   : > { %s5809_s16 = scalar_select %p4994_p8, 1, 0 }
  0x2c   : > { %p4438_p9 = pnand %p4994_p8, %p4436_p7 }
  0x2e   : > { %p4439_p10 = pneg %p4438_p9 }
  0x30   : > { %p4444_p12 = pnand %p4442_p11, %p4439_p10 }
  0x32   : > { %4447 = shalt.err (!%p4444_p12)
}
  0x33   : > { %s4448_s17 = scalar_lea.vmem %s4969_s26, 512  ;;  %p4456_p5 = scmp.lt.s32.totalorder %s4969_s26, %s4969_s26 }
  0x34   : > { %p4449_p13 = scmp.ne.s32.totalorder %s4969_s26, %s4448_s17  ;;  %p4457_p4 = scmp.lt.s32.totalorder %s4448_s17, %s4448_s17 }
  0x36   : > { %p4451_p0 = pnand %p4449_p13, %p4994_p8  ;;  %p4458_p7 = por %p4457_p4, %p4456_p5 }
  0x38   : > { %p4452_p2 = pneg %p4451_p0 }
  0x3a   : > { %p4459_p9 = pnand %p4458_p7, %p4452_p2 }
  0x3c   : > { %4462 = shalt.err (!%p4459_p9)
}
  0x3d   : > { %s5766_s18 = smov 128   ;;  %s5768_s12 = smov 8  }
  0x3e   : > { %4337 = dma.hbm_to_vmem [thread:$0]  (!%p4980_p6), %s5808_s3, 512, %s4969_s26, [#allocation9], %s5766_s18, %s5766_s18, %s5768_s12  }
  0x3f   : > { %s5810_s7 = sld [smem:[#allocation41_spill]] }
  0x45   : > { %s4463_s17 = scalar_lea.hbm %s5810_s7, 512 }
  0x46   : > { %p4464_p4 = scmp.ne.s32.totalorder %s5810_s7, %s4463_s17  ;;  %p4470_p12 = scmp.lt.u32.totalorder %s4463_s17, %s5810_s7 }
  0x48   : > { %p4466_p10 = pnand %p4464_p4, %p4994_p8 }
  0x4a   : > { %p4467_p11 = pneg %p4466_p10 }
  0x4c   : > { %p4472_p13 = pnand %p4470_p12, %p4467_p11 }
  0x4e   : > { %4475 = shalt.err (!%p4472_p13)
}
  0x4f   : > { %s4476_s26 = scalar_lea.vmem %s4984_s30, 512  ;;  %p4484_p7 = scmp.lt.s32.totalorder %s4984_s30, %s4984_s30 }
  0x50   : > { %p4477_p0 = scmp.ne.s32.totalorder %s4984_s30, %s4476_s26  ;;  %p4485_p9 = scmp.lt.s32.totalorder %s4476_s26, %s4476_s26 }
  0x52   : > { %p4479_p2 = pnand %p4477_p0, %p4994_p8  ;;  %p4486_p4 = por %p4485_p9, %p4484_p7 }
  0x54   : > { %p4480_p5 = pneg %p4479_p2 }
  0x56   : > { %p4487_p10 = pnand %p4486_p4, %p4480_p5 }
  0x58   : > { %4490 = shalt.err (!%p4487_p10)
}
  0x59   : > { %4343 = dma.hbm_to_vmem [thread:$0]  (!%p4980_p6), %s5810_s7, 512, %s4984_s30, [#allocation12], %s5766_s18, %s5766_s18, %s5768_s12  }
  0x5a   : > { %s5765_s14 = sadd.s32 4294967294, %s4839_s24   ;;  %s5046_s15 = sadd.s32 1, %s4839_s24  }
  0x5b   : > { %5811 = sst [smem:[#allocation32_spill]] %s5046_s15  ;;  %s49_s19 = ssub.s32 %s4839_s24, %s5046_s15 }
  0x5c   : > { %s52_s20 = sadd.s32 1, %s4835_s23  ;;  %p50_p11 = scmp.eq.s32.totalorder %s49_s19, 0 }
  0x5d   : > { %p59_p12 = scmp.ne.s32.totalorder %s4835_s23, %s4831_s22  ;;  %p60_p13 = scmp.eq.s32.totalorder %s4839_s24, 0 }
  0x5e   : > { %p65_p0 = scmp.ne.s32.totalorder %s4831_s22, %s4827_s21  ;;  %p351_p7 = scmp.eq.s32.totalorder %s4964_s27, 1 }
  0x5f   : > { %s5057_s25 = scalar_select %p50_p11, %s4835_s23, %s52_s20  }
  0x60   : > { %p61_p2 = por %p60_p13, %p59_p12  ;;  %p5061_p5 = por %p5777_p1, %p65_p0 }
  0x61   : > { %5812 = sst [smem:[#allocation33_spill]] %s5057_s25  ;;  %p357_p9 = scmp.eq.s32.totalorder %s5765_s14, 1 }
  0x62   : > { %s5813_s29 = scalar_select %p5061_p5, 1, 0 }
  0x63   : > { %p4378_p4 = scmp.lt.s32.totalorder %s4839_s24, 2  ;;  %s5770_s30 = sand.u32 1, %s4835_s23  }
  0x64   : > { %p5070_p10 = por %p351_p7, %p59_p12  ;;  %p5074_p3 = por %p357_p9, %p65_p0 }
  0x65   : > { %s5080_s10 = sshll.u32 %s5770_s30, 3  ;;  %s5083_s13 = sshll.u32 %s4839_s24, 7 }
  0x66   : > { %s5814_s17 = scalar_select %p5070_p10, 1, 0 }
  0x67   : > { %s5816_s26 = scalar_select %p5074_p3, 1, 0 }
  0x68   : > { %5815 = sst [smem:[#allocation34_spill]] %s5814_s17  ;;  %p5085_p11 = pnand %p4378_p4, %p61_p2 }
  0x69   : > { %5817 = sst [smem:[#allocation35_spill]] %s5816_s26  ;;  %s551_s20 = sand.u32 1, %s4839_s24  }
  0x6a   : > { %s5818_s19 = scalar_select %p5085_p11, 1, 0 }
  0x6b   : > { %s5819_s1 = sld [smem:[#allocation37_spill]]  ;;  %s555_s30 = scalar_lea.vmem [#allocation5], %s5080_s10 }
  0x6c   : > { %s562_s3 = sshll.u32 %s555_s30, 4  ;;  %s4845_s7 = smov [#allocation10]   ;;  %s5097_s3 = int_to_ptr.vmem [resolvable:$true] %s562_s3 }
  0x6d   : > { %s5099_s25 = sshll.u32 %s4845_s7, 4  ;;  %s5101_s15 = scalar_lea.sflag [#allocation6], %s551_s20  ;;  %s471_s25 = int_to_ptr.vmem [resolvable:$true] %s5099_s25 }
  0x6e   : > { %p5107_p13 = pneg %p5085_p11 }
  0x70   : > { %s5820_s18 = scalar_select %p5107_p13, 1, 0 }
  0x71   : > { %s5094_s12 = scalar_lea.hbm %s5819_s1, %s5083_s13  ;;  %s4496_s24 = scalar_lea.hbm %s5819_s1, 256 }
  0x72   : > { %s4491_s26 = scalar_lea.hbm %s5094_s12, 128  ;;  %p4497_p7 = scmp.lt.u32.totalorder %s5094_s12, %s5819_s1 }
  0x73   : > { %p4492_p12 = scmp.ne.s32.totalorder %s5094_s12, %s4491_s26  ;;  %p4498_p9 = scmp.lt.u32.totalorder %s4496_s24, %s4491_s26 }
  0x74   : > { %p4500_p1 = scmp.lt.u32.totalorder %s4491_s26, %s5094_s12 }
  0x75   : > { %p4494_p0 = pnand %p5107_p13, %p4492_p12  ;;  %p4499_p4 = por %p4498_p9, %p4497_p7 }
  0x77   : > { %p4495_p2 = pneg %p4494_p0  ;;  %p4501_p3 = por %p4500_p1, %p4499_p4 }
  0x79   : > { %p4502_p10 = pnand %p4501_p3, %p4495_p2 }
  0x7b   : > { %4505 = shalt.err (!%p4502_p10)
}
  0x7c   : > { %s4506_s20 = scalar_lea.vmem %s5097_s3, 128  ;;  %s4846_s14 = smov [#allocation5]  }
  0x7d   : > { %p4507_p12 = scmp.ne.s32.totalorder %s5097_s3, %s4506_s20  ;;  %s4511_s30 = sshll.u32 %s4846_s14, 4  ;;  %s4512_s30 = int_to_ptr.vmem [resolvable:$false] %s4511_s30 }
  0x7e   : > { %s4513_s21 = scalar_lea.vmem %s4512_s30, 256  ;;  %p4514_p6 = scmp.lt.s32.totalorder %s5097_s3, %s4512_s30 }
  0x7f   : > { %p4509_p0 = pnand %p4507_p12, %p5107_p13  ;;  %p4515_p8 = scmp.lt.s32.totalorder %s4513_s21, %s4506_s20 }
  0x81   : > { %p4510_p5 = pneg %p4509_p0  ;;  %p4516_p7 = por %p4515_p8, %p4514_p6 }
  0x83   : > { %p4517_p9 = pnand %p4516_p7, %p4510_p5 }
  0x85   : > { %4520 = shalt.err (!%p4517_p9)
}
  0x86   : > { %4356 = dma.hbm_to_vmem [thread:$0]  (!%p5085_p11), %s5094_s12, 128, %s5097_s3, %s5101_s15  }
  0x87   : > { %s4521_s7 = scalar_lea.hbm %s5747_s5, 512  ;;  %p5821_p3 = scmp.ne.s32.totalorder %s5809_s16, 0 }
  0x88   : > { %p4522_p1 = scmp.ne.s32.totalorder %s5747_s5, %s4521_s7  ;;  %p4528_p5 = scmp.lt.u32.totalorder %s4521_s7, %s5747_s5 }
  0x8a   : > { %p4524_p6 = pnand %p4522_p1, %p5821_p3 }
  0x8c   : > { %p4525_p8 = pneg %p4524_p6 }
  0x8e   : > { %p4530_p10 = pnand %p4528_p5, %p4525_p8 }
  0x90   : > { %4533 = shalt.err (!%p4530_p10)
}
  0x91   : > { %s4534_s21 = scalar_lea.vmem %s471_s25, 512  ;;  %p4542_p0 = scmp.lt.s32.totalorder %s471_s25, %s471_s25 }
  0x92   : > { %p4535_p2 = scmp.ne.s32.totalorder %s471_s25, %s4534_s21  ;;  %p4543_p7 = scmp.lt.s32.totalorder %s4534_s21, %s4534_s21 }
  0x94   : > { %p4537_p4 = pnand %p4535_p2, %p5821_p3  ;;  %p4544_p9 = por %p4543_p7, %p4542_p0 }
  0x96   : > { %p4538_p12 = pneg %p4537_p4 }
  0x98   : > { %p4545_p11 = pnand %p4544_p9, %p4538_p12 }
  0x9a   : > { %4548 = shalt.err (!%p4545_p11)
}
  0x9b   : > { %p5822_p1 = scmp.ne.s32.totalorder %s5807_s0, 0  ;;  %s5823_s1 = smov 8  }
  0x9c   : > { %s5824_s3 = smov 128   ;;  %s4847_s26 = smov [#allocation13]  }
  0x9d   : > { %4340 = dma.hbm_to_vmem [thread:$0]  (!%p5822_p1), %s5747_s5, 512, %s471_s25, [#allocation9], %s5824_s3, %s5824_s3, %s5823_s1  }
  0x9e   : > { %s500_s7 = sshll.u32 %s4847_s26, 4  ;;  %s4848_s14 = smov [#allocation14]   ;;  %s501_s7 = int_to_ptr.vmem [resolvable:$true] %s500_s7 }
  0x9f   : > { %s516_s20 = sshll.u32 %s4848_s14, 4  ;;  %s4549_s17 = scalar_lea.hbm %s5750_s8, 16  ;;  %s517_s20 = int_to_ptr.vmem [resolvable:$true] %s516_s20 }
  0xa0   : > { %p4550_p11 = scmp.ne.s32.totalorder %s5750_s8, %s4549_s17  ;;  %p4556_p5 = scmp.lt.u32.totalorder %s4549_s17, %s5750_s8 }
  0xa2   : > { %p4552_p6 = pnand %p4550_p11, %p5821_p3 }
  0xa4   : > { %p4553_p8 = pneg %p4552_p6 }
  0xa6   : > { %p4558_p10 = pnand %p4556_p5, %p4553_p8 }
  0xa8   : > { %4561 = shalt.err (!%p4558_p10)
}
  0xa9   : > { %s4562_s25 = scalar_lea.vmem %s501_s7, 16  ;;  %s4569_s24 = scalar_lea.vmem %s501_s7, 32 }
  0xaa   : > { %p4563_p2 = scmp.ne.s32.totalorder %s501_s7, %s4562_s25  ;;  %p4570_p0 = scmp.lt.s32.totalorder %s501_s7, %s501_s7 }
  0xab   : > { %p4571_p7 = scmp.lt.s32.totalorder %s4569_s24, %s4562_s25 }
  0xac   : > { %p4565_p4 = pnand %p4563_p2, %p5821_p3 }
  0xad   : > { %p4572_p9 = por %p4571_p7, %p4570_p0 }
  0xae   : > { %p4566_p12 = pneg %p4565_p4 }
  0xb0   : > { %p4573_p13 = pnand %p4572_p9, %p4566_p12 }
  0xb2   : > { %4576 = shalt.err (!%p4573_p13)
}
  0xb3   : > { %4346 = dma.hbm_to_vmem [thread:$0]  (!%p5822_p1), %s5750_s8, 16, %s501_s7, [#allocation12]  }
  0xb4   : > { %s4577_s26 = scalar_lea.hbm %s5753_s11, 512 }
  0xb5   : > { %p4578_p11 = scmp.ne.s32.totalorder %s5753_s11, %s4577_s26  ;;  %p4584_p13 = scmp.lt.u32.totalorder %s4577_s26, %s5753_s11 }
  0xb7   : > { %p4580_p6 = pnand %p4578_p11, %p5821_p3 }
  0xb9   : > { %p4581_p8 = pneg %p4580_p6 }
  0xbb   : > { %p4586_p5 = pnand %p4584_p13, %p4581_p8 }
  0xbd   : > { %4589 = shalt.err (!%p4586_p5)
}
  0xbe   : > { %s4590_s25 = scalar_lea.vmem %s517_s20, 512  ;;  %p4598_p12 = scmp.lt.s32.totalorder %s517_s20, %s517_s20 }
  0xbf   : > { %p4591_p10 = scmp.ne.s32.totalorder %s517_s20, %s4590_s25  ;;  %p4599_p0 = scmp.lt.s32.totalorder %s4590_s25, %s4590_s25 }
  0xc1   : > { %p4593_p2 = pnand %p4591_p10, %p5821_p3  ;;  %p4600_p7 = por %p4599_p0, %p4598_p12 }
  0xc3   : > { %p4594_p4 = pneg %p4593_p2 }
  0xc5   : > { %p4601_p9 = pnand %p4600_p7, %p4594_p4 }
  0xc7   : > { %4604 = shalt.err (!%p4601_p9)
}
  0xc8   : > { %4349 = dma.hbm_to_vmem [thread:$0]  (!%p5822_p1), %s5753_s11, 512, %s517_s20, [#allocation15], %s5824_s3, %s5824_s3, %s5823_s1  }
  0xc9   : > { %s5825_s6 = sld [smem:[#allocation36_spill]]  ;;  %s537_s0 = scalar_lea.vmem [#allocation2], %s5080_s10 }
  0xca   : > { %s544_s17 = sshll.u32 %s537_s0, 4  ;;  %s5205_s30 = scalar_lea.hbm %s5744_s2, %s5083_s13  ;;  %s5199_s17 = int_to_ptr.vmem [resolvable:$true] %s544_s17 }
  0xcb   : > { %s5826_s21 = sand.u32 1, %s4835_s23   ;;  %p5827_p1 = scmp.ne.s32.totalorder %s5820_s18, 0 }
  0xcc   : > { %s534_s1 = scalar_lea.sflag [#allocation3], %s5826_s21 }
  0xcf   : > { %s5196_s9 = scalar_lea.hbm %s5825_s6, %s5083_s13  ;;  %s4610_s25 = scalar_lea.hbm %s5825_s6, 256 }
  0xd0   : > { %s4605_s3 = scalar_lea.hbm %s5196_s9, 128  ;;  %p4611_p8 = scmp.lt.u32.totalorder %s5196_s9, %s5825_s6 }
  0xd1   : > { %p4606_p3 = scmp.ne.s32.totalorder %s5196_s9, %s4605_s3  ;;  %p4612_p13 = scmp.lt.u32.totalorder %s4610_s25, %s4605_s3 }
  0xd2   : > { %p4614_p10 = scmp.lt.u32.totalorder %s4605_s3, %s5196_s9 }
  0xd3   : > { %p4608_p11 = pnand %p4606_p3, %p5827_p1  ;;  %p4613_p5 = por %p4612_p13, %p4611_p8 }
  0xd5   : > { %p4609_p6 = pneg %p4608_p11  ;;  %p4615_p2 = por %p4614_p10, %p4613_p5 }
  0xd7   : > { %p4616_p4 = pnand %p4615_p2, %p4609_p6 }
  0xd9   : > { %4619 = shalt.err (!%p4616_p4)
}
  0xda   : > { %s4620_s13 = scalar_lea.vmem %s5199_s17, 128  ;;  %s4849_s16 = smov [#allocation2]  }
  0xdb   : > { %p4621_p12 = scmp.ne.s32.totalorder %s5199_s17, %s4620_s13  ;;  %s4625_s4 = sshll.u32 %s4849_s16, 4  ;;  %s4626_s4 = int_to_ptr.vmem [resolvable:$false] %s4625_s4 }
  0xdc   : > { %s4627_s0 = scalar_lea.vmem %s4626_s4, 256  ;;  %p4628_p9 = scmp.lt.s32.totalorder %s5199_s17, %s4626_s4 }
  0xdd   : > { %p4623_p0 = pnand %p4621_p12, %p5827_p1  ;;  %p4629_p3 = scmp.lt.s32.totalorder %s4627_s0, %s4620_s13 }
  0xdf   : > { %p4624_p7 = pneg %p4623_p0  ;;  %p4630_p11 = por %p4629_p3, %p4628_p9 }
  0xe1   : > { %p4631_p8 = pnand %p4630_p11, %p4624_p7 }
  0xe3   : > { %4634 = shalt.err (!%p4631_p8)
}
  0xe4   : > { %p5828_p6 = scmp.ne.s32.totalorder %s5818_s19, 0  ;;  %s573_s26 = scalar_lea.vmem [#allocation7], %s5080_s10 }
  0xe5   : > { %s580_s14 = sshll.u32 %s573_s26, 4  ;;  %s4635_s21 = scalar_lea.hbm %s5205_s30, 128  ;;  %s581_s14 = int_to_ptr.vmem [resolvable:$true] %s580_s14 }
  0xe6   : > { %4353 = dma.hbm_to_vmem [thread:$0]  (!%p5828_p6), %s5196_s9, 128, %s5199_s17, %s534_s1  }
  0xe7   : > { %p4636_p13 = scmp.ne.s32.totalorder %s5205_s30, %s4635_s21  ;;  %s4640_s12 = scalar_lea.hbm %s5744_s2, 256 }
  0xe8   : > { %p4641_p2 = scmp.lt.u32.totalorder %s5205_s30, %s5744_s2  ;;  %p4642_p4 = scmp.lt.u32.totalorder %s4640_s12, %s4635_s21 }
  0xe9   : > { %p4638_p5 = pnand %p4636_p13, %p5827_p1  ;;  %p4644_p0 = scmp.lt.u32.totalorder %s4635_s21, %s5205_s30 }
  0xea   : > { %p4643_p12 = por %p4642_p4, %p4641_p2 }
  0xeb   : > { %p4639_p10 = pneg %p4638_p5 }
  0xec   : > { %p4645_p7 = por %p4644_p0, %p4643_p12 }
  0xee   : > { %p4646_p9 = pnand %p4645_p7, %p4639_p10 }
  0xf0   : > { %4649 = shalt.err (!%p4646_p9)
}
  0xf1   : > { %s4650_s10 = scalar_lea.vmem %s581_s14, 128  ;;  %s4850_s9 = smov [#allocation7]  }
  0xf2   : > { %p4651_p3 = scmp.ne.s32.totalorder %s581_s14, %s4650_s10  ;;  %s4655_s17 = sshll.u32 %s4850_s9, 4  ;;  %s4656_s17 = int_to_ptr.vmem [resolvable:$false] %s4655_s17 }
  0xf3   : > { %s4657_s1 = scalar_lea.vmem %s4656_s17, 256  ;;  %p4658_p13 = scmp.lt.s32.totalorder %s581_s14, %s4656_s17 }
  0xf4   : > { %p4653_p11 = pnand %p4651_p3, %p5827_p1  ;;  %p4659_p5 = scmp.lt.s32.totalorder %s4657_s1, %s4650_s10 }
  0xf6   : > { %p4654_p8 = pneg %p4653_p11  ;;  %p4660_p6 = por %p4659_p5, %p4658_p13 }
  0xf8   : > { %p4661_p2 = pnand %p4660_p6, %p4654_p8 }
  0xfa   : > { %4664 = shalt.err (!%p4661_p2)
}
  0xfb   : > { %p5829_p4 = scmp.ne.s32.totalorder %s5818_s19, 0  ;;  %p5830_p10 = scmp.ne.s32.totalorder %s5806_s28, 0 }
  0xfc   : > { %s5252_s18 = sand.u32 (!%p5830_p10), 1, %s4831_s22   ;;  %p5831_p1 = scmp.ne.s32.totalorder (!%p5830_p10), %s5813_s29, 0 }
  0xfd   : > { %4359 = dma.hbm_to_vmem [thread:$0]  (!%p5829_p4), %s5205_s30, 128, %s581_s14, %s5101_s15  }
  0xfe   : > { %589 = sbr.rel (%p5830_p10) target bundleno = 923 (0x39b), region = 72  ;;  %s5255_s24 = sshll.u32 (!%p5830_p10), %s5252_s18, 3 }
  0xff   : > { %s592_s13 = scalar_lea.sflag (!%p5830_p10), [#allocation3], %s5252_s18  ;;  %s595_s16 = scalar_lea.vmem (!%p5830_p10), [#allocation2], %s5255_s24 }
 0x105   : > { %4794 = dma.done.wait (%p5831_p1), %s592_s13, 128  }
 0x106   : > { %4796 = vsyncadd (%p5831_p1), %s592_s13, 4294967168  ;;  %s600_s28 = sand.u32 1, %s4964_s27   ;;  %s604_s19 = scalar_lea.vmem [#allocation5], %s5255_s24 }
 0x107   : > { %s601_s15 = scalar_lea.sflag [#allocation6], %s600_s28 }
 0x108   : > { %4798 = dma.done.wait (%p5831_p1), %s601_s15, 256  }
 0x109   : > { %4800 = vsyncadd (%p5831_p1), %s601_s15, 4294967040  ;;  %s613_s30 = scalar_lea.vmem [#allocation7], %s5255_s24  ;;  %p5832_p6 = scmp.eq.s32.totalorder %s4964_s27, 0 }
 0x10b   : > { %4802 = dma.done.wait (%p5832_p6), [#allocation9], 1024   ;;  %p5833_p12 = pmov %p5832_p6 }
 0x10c   : > { %p5834_p0 = pmov %p5832_p6 }
 0x10d   : > { %4804 = vsyncadd (%p5833_p12), [#allocation9], 4294966272 }
 0x10e   : > { %4806 = dma.done.wait (%p5834_p0), [#allocation12], 528   ;;  %p5835_p7 = pmov %p5834_p0 }
 0x10f   : > { %p5836_p9 = pmov %p5834_p0 }
 0x110   : > { %4808 = vsyncadd (%p5835_p7), [#allocation12], 4294966768 }
 0x111   : > { %4810 = dma.done.wait (%p5836_p9), [#allocation15], 512   ;;  %p5837_p3 = pmov %p5834_p0 }
 0x112   : > { %v4851_v0 = vmov 0.0|0.0   ;;  %vm4852_vm0 = vmmov 0   ;;  %v4853_v1 = vmov 0.0   ;;  %vm719_vm1 = vcmask 261120   ;;  %v708_v2 = vld [vmem:[#allocation8] sm:$0xff]  ;;  %v709_v3 = vld [vmem:[#allocation8 + $0x8] sm:$0xff] }
 0x113   : > { %4812 = vsyncadd (%p5837_p3), [#allocation15], 4294966784  ;;  %4066 = vmatprep.subr.bf16.mxu1 %v4851_v0  ;;  %4084 = vmatprep.subr.bf16.mxu0 %v4851_v0  ;;  %v710_v4 = vld [vmem:[#allocation8 + $0x10] sm:$0xff]  ;;  %v724_v5 = vand.u32 4294901760, %v708_v2  ;;  %v727_v6 = vand.u32 4294901760, %v709_v3  ;;  %v711_v7 = vld [vmem:[#allocation8 + $0x18] sm:$0xff] }
 0x114   : > { %3744 = vmatprep.mubr.msk.f32.mxu1 %vm4852_vm0, %v4853_v1  ;;  %3777 = vmatprep.mubr.msk.f32.mxu0 %vm4852_vm0, %v4853_v1  ;;  %v730_v8 = vand.u32 4294901760, %v710_v4  ;;  %v707_v9 = vld [vmem:[%s604_s19] sm:$0xff]  ;;  %v733_v10 = vand.u32 4294901760, %v711_v7  ;;  %v1215_v39 = vld [vmem:[%s613_s30] sm:$0xff]  ;;  %s5838_s0 = sld [smem:[#allocation42_spill]]  ;;  %s5839_s10 = sld [smem:[#allocation39_spill]] }
 0x115   : > { %v721_v11 = vsel %vm719_vm1, %v707_v9, 0  ;;  %v4067_v12 = vpack.c.bf16 %v727_v6, %v724_v5  ;;  %v5291_v13 = vsub.f32 %v708_v2, %v724_v5  ;;  %v5293_v14 = vsub.f32 %v709_v3, %v727_v6  ;;  %v1216_v37 = vld [vmem:[#allocation10] sm:$0xff]  ;;  %v1217_v38 = vld [vmem:[#allocation10 + $0x8] sm:$0xff]  ;;  %v1218_v45 = vld [vmem:[#allocation10 + $0x10] sm:$0xff]  ;;  %s5840_s1 = sld [smem:[#allocation40_spill]]  ;;  %s685_s13 = scalar_lea.vmem [#allocation16], %s5255_s24 }
 0x116   : > { %v5295_v15 = vsub.f32 %v710_v4, %v730_v8  ;;  %v5297_v16 = vsub.f32 %v711_v7, %v733_v10  ;;  %v5299_v17 = vand.u32 4294901760, %v721_v11  ;;  %v5301_v18 = vpack.c.bf16 %v733_v10, %v730_v8  ;;  %v1219_v46 = vld [vmem:[#allocation10 + $0x18] sm:$0xff]  ;;  %s5588_s15 = sshll.u32 %s4964_s27, 7  ;;  %s5842_s29 = sld [smem:[#allocation45_spill]] }
 0x117   : > { %4068 = vmatpush3.bf16.msra.mxu1 %v4067_v12  ;;  %4086 = vmatpush3.bf16.msra.mxu0 %v4067_v12  ;;  %v805_v19 = vand.u32 4294901760, %v5291_v13  ;;  %v812_v20 = vand.u32 4294901760, %v5293_v14  ;;  %v1231_v42 = vand.u32 4294901760, %v1216_v37  ;;  %v1234_v43 = vand.u32 4294901760, %v1217_v38  ;;  %s3249_s26 = sshll.u32 %s685_s13, 4  ;;  %s3221_s14 = scalar_lea.sflag [#allocation4], %s5252_s18  ;;  %s3250_s26 = int_to_ptr.vmem [resolvable:$true] %s3249_s26 }
 0x118   : > { %v819_v21 = vand.u32 4294901760, %v5295_v15  ;;  %4069 = vmatprep.subr.bf16.mxu1 %v4851_v0  ;;  %4087 = vmatprep.subr.bf16.mxu0 %v4851_v0  ;;  %v5309_v22 = vsub.f32 %v721_v11, %v5299_v17  ;;  %v826_v23 = vand.u32 4294901760, %v5297_v16  ;;  %v1228_v44 = vsel %vm719_vm1, %v1215_v39, 0  ;;  %s4665_s21 = scalar_lea.vmem %s3250_s26, 128  ;;  %s4854_s3 = smov [#allocation16]  }
 0x119   : > { %v806_v24 = vsub.f32 %v5291_v13, %v805_v19  ;;  %v813_v25 = vsub.f32 %v5293_v14, %v812_v20  ;;  %v4091_v31 = vpack.c.bf16 %v812_v20, %v805_v19  ;;  %v4079_v47 = vpack.c.bf16 %v5293_v14, %v5291_v13  ;;  %v1727_v19 = vld [vmem:[#allocation11 + $0x8] sm:$0xff]  ;;  %p4666_p11 = scmp.ne.s32.totalorder %s3250_s26, %s4665_s21  ;;  %s4669_s20 = sshll.u32 %s4854_s3, 4  ;;  %s4670_s20 = int_to_ptr.vmem [resolvable:$false] %s4669_s20 }
 0x11a   : > { %v820_v26 = vsub.f32 %v5295_v15, %v819_v21  ;;  %v794_v27 = vand.u32 4294901760, %v5309_v22  ;;  %v827_v28 = vsub.f32 %v5297_v16, %v826_v23  ;;  %v4094_v40 = vpack.c.bf16 %v826_v23, %v819_v21  ;;  %v2227_v23 = vld [vmem:[%s5838_s0 + $0x8] sm:$0xff]  ;;  %s4671_s12 = scalar_lea.vmem %s4670_s20, 256  ;;  %p4672_p2 = scmp.lt.s32.totalorder %s3250_s26, %s4670_s20 }
 0x11b   : > { %4071 = vmatpush3.bf16.msra.mxu1 %v5301_v18  ;;  %4089 = vmatpush3.bf16.msra.mxu0 %v5301_v18  ;;  %v807_v29 = vand.u32 4294901760, %v806_v24  ;;  %v814_v30 = vand.u32 4294901760, %v813_v25  ;;  %v5334_v48 = vand.u32 4294901760, %v1228_v44  ;;  %v5336_v49 = vsub.f32 %v1216_v37, %v1231_v42  ;;  %v2229_v37 = vld [vmem:[%s5838_s0 + $0x18] sm:$0xff]  ;;  %p4673_p4 = scmp.lt.s32.totalorder %s4671_s12, %s4665_s21 }
 0x11c   : > { %v795_v32 = vsub.f32 %v5309_v22, %v794_v27  ;;  %4072 = vmatprep.subr.bf16.mxu1 %v4851_v0  ;;  %4090 = vmatprep.subr.bf16.mxu0 %v4851_v0  ;;  %v821_v34 = vand.u32 4294901760, %v820_v26  ;;  %v828_v35 = vand.u32 4294901760, %v827_v28  ;;  %v5338_v50 = vsub.f32 %v1217_v38, %v1234_v43  ;;  %s5594_s4 = scalar_lea.hbm %s5842_s29, %s5588_s15 }
 0x11d   : > { %v4073_v33 = vpack.c.bf16 %v814_v30, %v807_v29  ;;  %v1237_v51 = vand.u32 4294901760, %v1218_v45  ;;  %v1240_v52 = vand.u32 4294901760, %v1219_v46  ;;  %v4082_v53 = vpack.c.bf16 %v5297_v16, %v5295_v15  ;;  %p4674_p10 = por %p4673_p4, %p4672_p2 }
 0x11e   : > { %v796_v36 = vand.u32 4294901760, %v795_v32  ;;  %3778 = vmatmul.mubr.f32.vlgmr.msra.gmra.mrb[0].mxu0 %v794_v27  ;;  %v4076_v41 = vpack.c.bf16 %v828_v35, %v821_v34  ;;  %v1300_v54 = vsub.f32 %v1228_v44, %v5334_v48  ;;  %v1312_v57 = vand.u32 4294901760, %v5336_v49  ;;  %v1728_v32 = vld [vmem:[#allocation11 + $0x10] sm:$0xff] }
 0x11f   : > { %4092 = vmatpush3.bf16.msra.mxu0 %v4091_v31  ;;  %3788 = vmatprep.mubr.msk.f32.mxu0 %vm4852_vm0, %v4853_v1  ;;  %v1325_v55 = vsub.f32 %v1218_v45, %v1237_v51  ;;  %v1332_v56 = vsub.f32 %v1219_v46, %v1240_v52  ;;  %v1319_v58 = vand.u32 4294901760, %v5338_v50  ;;  %v4103_v59 = vpack.c.bf16 %v1234_v43, %v1231_v42 }
 0x120   : > { %3745 = vmatmul.mubr.f32.vlgmr.msra.gmra.mrb[0].mxu1 %v796_v36  ;;  %4093 = vmatprep.subr.bf16.mxu0 %v4851_v0  ;;  %v1301_v60 = vand.u32 4294901760, %v1300_v54  ;;  %v1313_v61 = vsub.f32 %v5336_v49, %v1312_v57  ;;  %v4106_v3 = vpack.c.bf16 %v1240_v52, %v1237_v51  ;;  %v4115_v14 = vpack.c.bf16 %v5338_v50, %v5336_v49  ;;  %v2228_v36 = vld [vmem:[%s5838_s0 + $0x10] sm:$0xff] }
 0x121   : > { %4074 = vmatpush3.bf16.msra.mxu1 %v4073_v33  ;;  %3755 = vmatprep.mubr.msk.f32.mxu1 %vm4852_vm0, %v4853_v1  ;;  %v1320_v62 = vsub.f32 %v5338_v50, %v1319_v58  ;;  %v1326_v63 = vand.u32 4294901760, %v1325_v55  ;;  %v1333_v2 = vand.u32 4294901760, %v1332_v56  ;;  %v4118_v15 = vpack.c.bf16 %v1332_v56, %v1325_v55  ;;  %v1729_v33 = vld [vmem:[#allocation11 + $0x18] sm:$0xff] }
 0x122   : > { %4075 = vmatprep.subr.bf16.mxu1 %v4851_v0  ;;  %v1302_v4 = vsub.f32 %v1300_v54, %v1301_v60  ;;  %v1314_v5 = vand.u32 4294901760, %v1313_v61  ;;  %v4127_v16 = vpack.c.bf16 %v1319_v58, %v1312_v57  ;;  %v1744_v21 = vand.u32 4294901760, %v1727_v19 }
 0x123   : > { %4095 = vmatpush3.bf16.msra.mxu0 %v4094_v40  ;;  %v1321_v6 = vand.u32 4294901760, %v1320_v62  ;;  %v1327_v7 = vsub.f32 %v1325_v55, %v1326_v63  ;;  %v1334_v8 = vsub.f32 %v1332_v56, %v1333_v2  ;;  %v2241_v25 = vand.u32 4294901760, %v2227_v23 }
 0x124   : > { %4096 = vmatprep.subr.bf16.mxu0 %v4851_v0  ;;  %v1303_v9 = vand.u32 4294901760, %v1302_v4  ;;  %v5404_v28 = vsub.f32 %v1727_v19, %v1744_v21  ;;  %v1747_v34 = vand.u32 4294901760, %v1728_v32  ;;  %v1750_v35 = vand.u32 4294901760, %v1729_v33 }
 0x125   : > { %4077 = vmatpush3.bf16.msra.mxu1 %v4076_v41  ;;  %v4109_v10 = vpack.c.bf16 %v1321_v6, %v1314_v5  ;;  %v1328_v11 = vand.u32 4294901760, %v1327_v7  ;;  %v5410_v31 = vsub.f32 %v2227_v23, %v2241_v25  ;;  %v2244_v40 = vand.u32 4294901760, %v2228_v36 }
 0x126   : > { %4078 = vmatprep.subr.bf16.mxu1 %v4851_v0  ;;  %3789 = vmatmul.mubr.f32.vlgmr.msra.gmra.mrb[0].mxu0 %v5299_v17  ;;  %v1829_v39 = vand.u32 4294901760, %v5404_v28  ;;  %v2247_v41 = vand.u32 4294901760, %v2229_v37  ;;  %v5423_v42 = vpack.c.bf16 %v1750_v35, %v1747_v34  ;;  %v5425_v43 = vsub.f32 %v1728_v32, %v1747_v34 }
 0x127   : > { %4098 = vmatpush3.bf16.msra.mxu0 %v4067_v12  ;;  %3799 = vmatprep.mubr.msk.f32.mxu0 %vm4852_vm0, %v4853_v1  ;;  %v1335_v12 = vand.u32 4294901760, %v1334_v8  ;;  %v5427_v44 = vsub.f32 %v1729_v33, %v1750_v35  ;;  %v2326_v52 = vand.u32 4294901760, %v5410_v31 }
 0x128   : > { %3756 = vmatmul.mubr.f32.vlgmr.msra.gmra.mrb[0].mxu1 %v5299_v17  ;;  %4099 = vmatprep.subr.bf16.mxu0 %v4851_v0  ;;  %v5431_v46 = vpack.c.bf16 %v2247_v41, %v2244_v40  ;;  %v1830_v49 = vsub.f32 %v5404_v28, %v1829_v39 }
 0x129   : > { %4080 = vmatpush3.bf16.msra.mxu1 %v4079_v47  ;;  %3766 = vmatprep.mubr.msk.f32.mxu1 %vm4852_vm0, %v4853_v1  ;;  %v4112_v13 = vpack.c.bf16 %v1335_v12, %v1328_v11  ;;  %v5433_v47 = vsub.f32 %v2228_v36, %v2244_v40  ;;  %v1843_v55 = vand.u32 4294901760, %v5427_v44  ;;  %v2327_v57 = vsub.f32 %v5410_v31, %v2326_v52 }
 0x12a   : > { %4081 = vmatprep.subr.bf16.mxu1 %v4851_v0 }
 0x12b   : > { %4101 = vmatpush3.bf16.msra.mxu0 %v5301_v18  ;;  %v1726_v18 = vld [vmem:[#allocation11] sm:$0xff]  ;;  %v2333_v58 = vand.u32 4294901760, %v5433_v47  ;;  %v1844_v62 = vsub.f32 %v5427_v44, %v1843_v55 }
 0x12c   : > { %4138 = vmatprep.subr.bf16.mxu0 %v4851_v0  ;;  %v1741_v20 = vand.u32 4294901760, %v1726_v18 }
 0x12d   : > { %4083 = vmatpush3.bf16.msra.mxu1 %v4082_v53  ;;  %v1831_v53 = vand.u32 4294901760, %v1830_v49  ;;  %v1845_v6 = vand.u32 4294901760, %v1844_v62 }
 0x12e   : > { %4102 = vmatprep.subr.bf16.mxu1 %v4851_v0  ;;  %3800 = vmatmul.mubr.f32.vlgmr.msra.gmra.mrb[0].mxu0 %v5299_v17  ;;  %v4130_v17 = vpack.c.bf16 %v1333_v2, %v1326_v63  ;;  %v5400_v26 = vpack.c.bf16 %v1744_v21, %v1741_v20  ;;  %v5402_v27 = vsub.f32 %v1726_v18, %v1741_v20  ;;  %v2328_v2 = vand.u32 4294901760, %v2327_v57  ;;  %v3569_v20 = vld [vmem:[%s5839_s10] ss:$0 sm:$0xff] }
 0x12f   : > { %3876 = vmatprep.mubr.msk.f32.mxu0 %vm4852_vm0, %v4853_v1 }
 0x130   : > { %3767 = vmatmul.mubr.f32.vlgmr.msra.gmra.mrb[0].mxu1 %v5309_v22  ;;  %v2226_v22 = vld [vmem:[%s5838_s0] sm:$0xff]  ;;  %4140 = vmatpush3.bf16.msra.mxu0 %v5400_v26  ;;  %v1822_v38 = vand.u32 4294901760, %v5402_v27  ;;  %v4151_v12 = vpack.c.bf16 %v5404_v28, %v5402_v27 }
 0x131   : > { %4104 = vmatpush3.bf16.msra.mxu1 %v4103_v59  ;;  %3810 = vmatprep.mubr.msk.f32.mxu1 %vm4852_vm0, %v4853_v1  ;;  %v2238_v24 = vand.u32 4294901760, %v2226_v22 }
 0x132   : > { %4105 = vmatprep.subr.bf16.mxu1 %v4851_v0  ;;  %4141 = vmatprep.subr.bf16.mxu0 %v4851_v0  ;;  %v1823_v45 = vsub.f32 %v5402_v27, %v1822_v38 }
 0x133   : > { %v5406_v29 = vpack.c.bf16 %v2241_v25, %v2238_v24  ;;  %v5408_v30 = vsub.f32 %v2226_v22, %v2238_v24 }
 0x134   : > { %4143 = vmatpush3.bf16.msra.mxu0 %v5423_v42  ;;  %v1824_v50 = vand.u32 4294901760, %v1823_v45 }
 0x135   : > { %4107 = vmatpush3.bf16.msra.mxu1 %v4106_v3  ;;  %v2319_v51 = vand.u32 4294901760, %v5408_v30  ;;  %4144 = vmatprep.subr.bf16.mxu0 %v4851_v0 }
 0x136   : > { %4108 = vmatprep.subr.bf16.mxu1 %v4851_v0 }
 0x137   : > { %v2320_v56 = vsub.f32 %v5408_v30, %v2319_v51 }
 0x138   : > { %3811 = vmatmul.mubr.f32.vlgmr.msra.gmra.mrb[2].mxu1 %v1303_v9 }
 0x139   : > { %4110 = vmatpush3.bf16.msra.mxu1 %v4109_v10  ;;  %3821 = vmatprep.mubr.msk.f32.mxu1 %vm4852_vm0, %v4853_v1  ;;  %v2321_v63 = vand.u32 4294901760, %v2320_v56 }
 0x13a   : > { %4111 = vmatprep.subr.bf16.mxu1 %v4851_v0 }
 0x13b   : > { %v4181_v7 = vpack.c.bf16 %v2328_v2, %v2321_v63 }
 0x13d   : > { %4113 = vmatpush3.bf16.msra.mxu1 %v4112_v13  ;;  %v4187_v13 = vpack.c.bf16 %v5410_v31, %v5408_v30  ;;  %v3571_v30 = vld [vmem:[%s5840_s1] ss:$0 sm:$0xff] }
 0x13e   : > { %4114 = vmatprep.subr.bf16.mxu1 %v4851_v0 }
 0x140   : > { %3822 = vmatmul.mubr.f32.vlgmr.msra.gmra.mrb[2].mxu1 %v5334_v48 }
 0x141   : > { %4116 = vmatpush3.bf16.msra.mxu1 %v4115_v14  ;;  %3832 = vmatprep.mubr.msk.f32.mxu1 %vm4852_vm0, %v4853_v1  ;;  %v4154_v14 = vpack.c.bf16 %v5427_v44, %v5425_v43 }
 0x142   : > { %4117 = vmatprep.subr.bf16.mxu1 %v4851_v0 }
 0x145   : > { %4119 = vmatpush3.bf16.msra.mxu1 %v4118_v15 }
 0x146   : > { %4120 = vmatprep.subr.bf16.mxu1 %v4851_v0 }
 0x148   : > { %3833 = vmatmul.mubr.f32.vlgmr.msra.gmra.mrb[2].mxu1 %v1300_v54  ;;  %v1836_v54 = vand.u32 4294901760, %v5425_v43 }
 0x149   : > { %4122 = vmatpush3.bf16.msra.mxu1 %v4103_v59  ;;  %3843 = vmatprep.mubr.msk.f32.mxu1 %vm4852_vm0, %v4853_v1 }
 0x14a   : > { %4123 = vmatprep.subr.bf16.mxu1 %v4851_v0  ;;  %v1837_v61 = vsub.f32 %v5425_v43, %v1836_v54  ;;  %v5466_v18 = vpack.c.bf16 %v1843_v55, %v1836_v54  ;;  %v2723_v54 = vld [vmem:[#allocation14] sm:$0xff]  ;;  %v2724_v55 = vld [vmem:[#allocation14 + $0x8] sm:$0xff] }
 0x14b   : > { %v2735_v56 = vand.u32 4294901760, %v2723_v54  ;;  %v2738_v57 = vand.u32 4294901760, %v2724_v55 }
 0x14c   : > { %v1838_v5 = vand.u32 4294901760, %v1837_v61 }
 0x14d   : > { %4125 = vmatpush3.bf16.msra.mxu1 %v4106_v3  ;;  %v2822_v61 = vsub.f32 %v2724_v55, %v2738_v57 }
 0x14e   : > { %4126 = vmatprep.subr.bf16.mxu1 %v4851_v0  ;;  %v4148_v10 = vpack.c.bf16 %v1845_v6, %v1838_v5  ;;  %v4211_v6 = vpack.c.bf16 %v2738_v57, %v2735_v56 }
 0x14f   : > { %v2823_v5 = vand.u32 4294901760, %v2822_v61 }
 0x150   : > { %3844 = vmatmul.mubr.f32.vlgmr.msra.gmra.mrb[2].mxu1 %v1301_v60  ;;  %v4145_v60 = vpack.c.bf16 %v1831_v53, %v1824_v50 }
 0x151   : > { %4128 = vmatpush3.bf16.msra.mxu1 %v4127_v16  ;;  %3854 = vmatprep.mubr.msk.f32.mxu1 %vm4852_vm0, %v4853_v1  ;;  %v5462_v16 = vpack.c.bf16 %v1829_v39, %v1822_v38 }
 0x152   : > { %4129 = vmatprep.subr.bf16.mxu1 %v4851_v0 }
 0x155   : > { %4131 = vmatpush3.bf16.msra.mxu1 %v4130_v17  ;;  %v5464_v17 = vpack.c.bf16 %v2326_v52, %v2319_v51 }
 0x156   : > { %4132 = vmatprep.subr.bf16.mxu1 %v4851_v0 }
 0x158   : > { %3855 = vmatmul.mubr.f32.vlgmr.msra.gmra.mrb[2].mxu1 %v5334_v48 }
 0x159   : > { %4134 = vmatpush3.bf16.msra.mxu1 %v4103_v59  ;;  %3865 = vmatprep.mubr.msk.f32.mxu1 %vm4852_vm0, %v4853_v1 }
 0x15a   : > { %4135 = vmatprep.subr.bf16.mxu1 %v4851_v0 }
 0x15d   : > { %4137 = vmatpush3.bf16.msra.mxu1 %v4106_v3  ;;  %v2334_v3 = vsub.f32 %v5433_v47, %v2333_v58 }
 0x15e   : > { %4174 = vmatprep.subr.bf16.mxu1 %v4851_v0 }
 0x15f   : > { %v2335_v8 = vand.u32 4294901760, %v2334_v3 }
 0x160   : > { %3866 = vmatmul.mubr.f32.vlgmr.msra.gmra.mrb[2].mxu1 %v5334_v48  ;;  %v5435_v48 = vsub.f32 %v2229_v37, %v2247_v41  ;;  %v1722_v41 = vld [vmem:[%s595_s16] sm:$0xff]  ;;  %s5841_s16 = sld [smem:[#allocation34_spill]] }
 0x161   : > { %3942 = vmatprep.mubr.msk.f32.mxu1 %vm4852_vm0, %v4853_v1  ;;  %4176 = vmatpush3.bf16.msra.mxu1 %v5406_v29 }
 0x162   : > { %4177 = vmatprep.subr.bf16.mxu1 %v4851_v0  ;;  %v2340_v59 = vand.u32 4294901760, %v5435_v48  ;;  %v4190_v15 = vpack.c.bf16 %v5435_v48, %v5433_v47 }
 0x164   : > { %v2341_v4 = vsub.f32 %v5435_v48, %v2340_v59  ;;  %v5468_v19 = vpack.c.bf16 %v2340_v59, %v2333_v58  ;;  %v2725_v58 = vld [vmem:[#allocation14 + $0x10] sm:$0xff]  ;;  %v2726_v59 = vld [vmem:[#allocation14 + $0x18] sm:$0xff] }
 0x165   : > { %4179 = vmatpush3.bf16.msra.mxu1 %v5431_v46  ;;  %v2741_v62 = vand.u32 4294901760, %v2725_v58  ;;  %v2744_v63 = vand.u32 4294901760, %v2726_v59 }
 0x166   : > { %4180 = vmatprep.subr.bf16.mxu1 %v4851_v0  ;;  %v2342_v9 = vand.u32 4294901760, %v2341_v4  ;;  %p5843_p8 = scmp.ne.s32.totalorder %s5841_s16, 0 }
 0x167   : > { %v2829_v2 = vsub.f32 %v2725_v58, %v2741_v62  ;;  %v2836_v3 = vsub.f32 %v2726_v59, %v2744_v63 }
 0x168   : > { %v4184_v11 = vpack.c.bf16 %v2342_v9, %v2335_v8  ;;  %v4214_v9 = vpack.c.bf16 %v2744_v63, %v2741_v62  ;;  %p4667_p13 = pnand %p4666_p11, %p5843_p8 }
 0x169   : > { %v2837_v8 = vand.u32 4294901760, %v2836_v3 }
 0x16a   : > { %p4668_p5 = pneg %p4667_p13 }
 0x16c   : > { %p4675_p1 = pnand %p4674_p10, %p4668_p5 }
 0x201   : > { %v1204_v21 = vpop.f32.mrb[0].mxu0 }
 0x202   : > { %v3801_v22 = vpop.f32.mrb[1].mxu0 }
 0x203   : > { %v969_v23 = vpop.f32.mrb[0].mxu1 }
 0x204   : > { %v4246_v24 = vadd.f32 %v3569_v20, %v969_v23  ;;  %v3768_v25 = vpop.f32.mrb[1].mxu1 }
 0x206   : > { %v4247_v27 = vadd.f32 %v4246_v24, %v1204_v21 }
 0x208   : > { %v3570_v28 = vmul.f32 -1.442695, %v4247_v27 }
 0x20a   : > { %4427 = vpow2.f32 %v3570_v28 }
 0x214   : > { %v4428_v35 = vpop.eup %4427 }
 0x215   : > { %v1211_v36 = vadd.f32 1.0, %v4428_v35 }
 0x233   : > { %v1711_v31 = vpop.f32.mrb[2].mxu1 }
 0x234   : > { %v4248_v32 = vadd.f32 %v3571_v30, %v1711_v31  ;;  %v3867_v33 = vpop.f32.mrb[3].mxu1 }
 0x236   : > { %v3572_v34 = vmul.f32 -1.442695, %v4248_v32 }
 0x238   : > { %4429 = vpow2.f32 %v3572_v34 }
 0x239   : > { %4431 = vrcp.f32 %v1211_v36 }
 0x242   : > { %v4430_v37 = vpop.eup %4429 }
 0x243   : > { %v1718_v38 = vadd.f32 1.0, %v4430_v37  ;;  %v4432_v39 = vpop.eup %4431 }
 0x244   : > { %v1214_v40 = vmul.f32 %v4432_v39, %v4247_v27 }
 0x245   : > { %4433 = vrcp.f32 %v1718_v38 }
 0x246   : > { %v1723_v44 = vadd.f32 %v1722_v41, %v1214_v40 }
 0x24f   : > { %v4434_v43 = vpop.eup %4433 }
 0x250   : > { %v1721_v45 = vmul.f32 %v4434_v43, %v4248_v32 }
 0x252   : > { %v1724_v47 = vadd.f32 %v1723_v44, %v1721_v45 }
 0x254   : > { %v1738_v48 = vsel %vm719_vm1, %v1724_v47, 0  ;;  %1725 = vst.msk [vmem:[%s685_s13] sm:$0xff] %vm719_vm1, %v1724_v47 }
 0x255   : > { %v5483_v49 = vand.u32 4294901760, %v1738_v48 }
 0x257   : > { %v5486_v50 = vsub.f32 %v1738_v48, %v5483_v49 }
 0x259   : > { %v5489_v51 = vand.u32 4294901760, %v5486_v50 }
 0x25b   : > { %v1812_v52 = vsub.f32 %v5486_v50, %v5489_v51 }
 0x25d   : > { %v5493_v53 = vand.u32 4294901760, %v1812_v52 }
 0x25f   : > { %3877 = vmatmul.mubr.f32.vlgmr.msra.gmra.mrb[2].mxu0 %v5493_v53  ;;  %3943 = vmatmul.mubr.f32.vlgmr.msra.gmra.mrb[4].mxu1 %v5493_v53 }
 0x260   : > { %4146 = vmatpush3.bf16.msra.mxu0 %v4145_v60  ;;  %4182 = vmatpush3.bf16.msra.mxu1 %v4181_v7  ;;  %v2815_v60 = vsub.f32 %v2723_v54, %v2735_v56  ;;  %v2830_v7 = vand.u32 4294901760, %v2829_v2 }
 0x261   : > { %4147 = vmatprep.subr.bf16.mxu0 %v4851_v0  ;;  %4183 = vmatprep.subr.bf16.mxu1 %v4851_v0 }
 0x262   : > { %3887 = vmatprep.mubr.msk.f32.mxu0 %vm4852_vm0, %v4853_v1  ;;  %3953 = vmatprep.mubr.msk.f32.mxu1 %vm4852_vm0, %v4853_v1  ;;  %v2816_v4 = vand.u32 4294901760, %v2815_v60 }
 0x264   : > { %4149 = vmatpush3.bf16.msra.mxu0 %v4148_v10  ;;  %4185 = vmatpush3.bf16.msra.mxu1 %v4184_v11 }
 0x265   : > { %4150 = vmatprep.subr.bf16.mxu0 %v4851_v0  ;;  %4186 = vmatprep.subr.bf16.mxu1 %v4851_v0 }
 0x267   : > { %3888 = vmatmul.mubr.f32.vlgmr.msra.gmra.mrb[2].mxu0 %v5483_v49  ;;  %3954 = vmatmul.mubr.f32.vlgmr.msra.gmra.mrb[4].mxu1 %v5483_v49 }
 0x268   : > { %4152 = vmatpush3.bf16.msra.mxu0 %v4151_v12  ;;  %4188 = vmatpush3.bf16.msra.mxu1 %v4187_v13  ;;  %v2838_v12 = vsub.f32 %v2836_v3, %v2837_v8 }
 0x269   : > { %4153 = vmatprep.subr.bf16.mxu0 %v4851_v0  ;;  %4189 = vmatprep.subr.bf16.mxu1 %v4851_v0 }
 0x26a   : > { %3898 = vmatprep.mubr.msk.f32.mxu0 %vm4852_vm0, %v4853_v1  ;;  %3964 = vmatprep.mubr.msk.f32.mxu1 %vm4852_vm0, %v4853_v1 }
 0x26c   : > { %4155 = vmatpush3.bf16.msra.mxu0 %v4154_v14  ;;  %4191 = vmatpush3.bf16.msra.mxu1 %v4190_v15  ;;  %v2839_v14 = vand.u32 4294901760, %v2838_v12 }
 0x26d   : > { %4156 = vmatprep.subr.bf16.mxu0 %v4851_v0  ;;  %4192 = vmatprep.subr.bf16.mxu1 %v4851_v0 }
 0x26f   : > { %3899 = vmatmul.mubr.f32.vlgmr.msra.gmra.mrb[2].mxu0 %v5486_v50  ;;  %3965 = vmatmul.mubr.f32.vlgmr.msra.gmra.mrb[4].mxu1 %v5486_v50 }
 0x270   : > { %4158 = vmatpush3.bf16.msra.mxu0 %v5400_v26  ;;  %4194 = vmatpush3.bf16.msra.mxu1 %v5406_v29 }
 0x271   : > { %4159 = vmatprep.subr.bf16.mxu0 %v4851_v0  ;;  %4195 = vmatprep.subr.bf16.mxu1 %v4851_v0 }
 0x272   : > { %3909 = vmatprep.mubr.msk.f32.mxu0 %vm4852_vm0, %v4853_v1  ;;  %3975 = vmatprep.mubr.msk.f32.mxu1 %vm4852_vm0, %v4853_v1 }
 0x274   : > { %4161 = vmatpush3.bf16.msra.mxu0 %v5423_v42  ;;  %4197 = vmatpush3.bf16.msra.mxu1 %v5431_v46 }
 0x275   : > { %4162 = vmatprep.subr.bf16.mxu0 %v4851_v0  ;;  %4198 = vmatprep.subr.bf16.mxu1 %v4851_v0 }
 0x277   : > { %3910 = vmatmul.mubr.f32.vlgmr.msra.gmra.mrb[2].mxu0 %v5489_v51  ;;  %3976 = vmatmul.mubr.f32.vlgmr.msra.gmra.mrb[4].mxu1 %v5489_v51 }
 0x278   : > { %4164 = vmatpush3.bf16.msra.mxu0 %v5462_v16  ;;  %4200 = vmatpush3.bf16.msra.mxu1 %v5464_v17  ;;  %v4223_v16 = vpack.c.bf16 %v2822_v61, %v2815_v60  ;;  %v4226_v17 = vpack.c.bf16 %v2836_v3, %v2829_v2 }
 0x279   : > { %4165 = vmatprep.subr.bf16.mxu0 %v4851_v0  ;;  %4201 = vmatprep.subr.bf16.mxu1 %v4851_v0 }
 0x27a   : > { %3920 = vmatprep.mubr.msk.f32.mxu0 %vm4852_vm0, %v4853_v1  ;;  %3986 = vmatprep.mubr.msk.f32.mxu1 %vm4852_vm0, %v4853_v1 }
 0x27c   : > { %4167 = vmatpush3.bf16.msra.mxu0 %v5466_v18  ;;  %4203 = vmatpush3.bf16.msra.mxu1 %v5468_v19  ;;  %v4235_v18 = vpack.c.bf16 %v2823_v5, %v2816_v4  ;;  %v4238_v19 = vpack.c.bf16 %v2837_v8, %v2830_v7 }
 0x27d   : > { %4168 = vmatprep.subr.bf16.mxu0 %v4851_v0  ;;  %4204 = vmatprep.subr.bf16.mxu1 %v4851_v0 }
 0x27f   : > { %3921 = vmatmul.mubr.f32.vlgmr.msra.gmra.mrb[2].mxu0 %v5483_v49  ;;  %3987 = vmatmul.mubr.f32.vlgmr.msra.gmra.mrb[4].mxu1 %v5483_v49 }
 0x280   : > { %4170 = vmatpush3.bf16.msra.mxu0 %v5400_v26  ;;  %4206 = vmatpush3.bf16.msra.mxu1 %v5406_v29  ;;  %v2817_v26 = vsub.f32 %v2815_v60, %v2816_v4  ;;  %v2824_v29 = vsub.f32 %v2822_v61, %v2823_v5 }
 0x281   : > { %4171 = vmatprep.subr.bf16.mxu0 %v4851_v0  ;;  %4207 = vmatprep.subr.bf16.mxu1 %v4851_v0 }
 0x282   : > { %3931 = vmatprep.mubr.msk.f32.mxu0 %vm4852_vm0, %v4853_v1  ;;  %3997 = vmatprep.mubr.msk.f32.mxu1 %vm4852_vm0, %v4853_v1  ;;  %v2818_v10 = vand.u32 4294901760, %v2817_v26  ;;  %v2825_v11 = vand.u32 4294901760, %v2824_v29 }
 0x284   : > { %4173 = vmatpush3.bf16.msra.mxu0 %v5423_v42  ;;  %4209 = vmatpush3.bf16.msra.mxu1 %v5431_v46  ;;  %v2831_v42 = vsub.f32 %v2829_v2, %v2830_v7  ;;  %v4217_v46 = vpack.c.bf16 %v2825_v11, %v2818_v10 }
 0x285   : > { %4210 = vmatprep.subr.bf16.mxu0 %v4851_v0 }
 0x286   : > { %v2832_v13 = vand.u32 4294901760, %v2831_v42 }
 0x287   : > { %3932 = vmatmul.mubr.f32.vlgmr.msra.gmra.mrb[2].mxu0 %v5483_v49  ;;  %3998 = vmatmul.mubr.f32.vlgmr.msra.gmra.mrb[4].mxu1 %v5483_v49 }
 0x288   : > { %4212 = vmatpush3.bf16.msra.mxu0 %v4211_v6  ;;  %4008 = vmatprep.mubr.msk.f32.mxu0 %vm4852_vm0, %v4853_v1  ;;  %v4220_v15 = vpack.c.bf16 %v2839_v14, %v2832_v13 }
 0x289   : > { %4213 = vmatprep.subr.bf16.mxu0 %v4851_v0 }
 0x28c   : > { %4215 = vmatpush3.bf16.msra.mxu0 %v4214_v9 }
 0x28d   : > { %4216 = vmatprep.subr.bf16.mxu0 %v4851_v0 }
 0x28f   : > { %4009 = vmatmul.mubr.f32.vlgmr.msra.gmra.mrb[4].mxu0 %v5493_v53 }
 0x290   : > { %4218 = vmatpush3.bf16.msra.mxu0 %v4217_v46  ;;  %4019 = vmatprep.mubr.msk.f32.mxu0 %vm4852_vm0, %v4853_v1 }
 0x291   : > { %4219 = vmatprep.subr.bf16.mxu0 %v4851_v0 }
 0x294   : > { %4221 = vmatpush3.bf16.msra.mxu0 %v4220_v15 }
 0x295   : > { %4222 = vmatprep.subr.bf16.mxu0 %v4851_v0 }
 0x297   : > { %4020 = vmatmul.mubr.f32.vlgmr.msra.gmra.mrb[4].mxu0 %v5483_v49 }
 0x298   : > { %4224 = vmatpush3.bf16.msra.mxu0 %v4223_v16  ;;  %4030 = vmatprep.mubr.msk.f32.mxu0 %vm4852_vm0, %v4853_v1 }
 0x299   : > { %4225 = vmatprep.subr.bf16.mxu0 %v4851_v0 }
 0x29c   : > { %4227 = vmatpush3.bf16.msra.mxu0 %v4226_v17 }
 0x29d   : > { %4228 = vmatprep.subr.bf16.mxu0 %v4851_v0 }
 0x29f   : > { %4031 = vmatmul.mubr.f32.vlgmr.msra.gmra.mrb[4].mxu0 %v5486_v50 }
 0x2a0   : > { %4230 = vmatpush3.bf16.msra.mxu0 %v4211_v6  ;;  %4041 = vmatprep.mubr.msk.f32.mxu0 %vm4852_vm0, %v4853_v1 }
 0x2a1   : > { %4231 = vmatprep.subr.bf16.mxu0 %v4851_v0 }
 0x2a4   : > { %4233 = vmatpush3.bf16.msra.mxu0 %v4214_v9 }
 0x2a5   : > { %4234 = vmatprep.subr.bf16.mxu0 %v4851_v0 }
 0x2a7   : > { %4042 = vmatmul.mubr.f32.vlgmr.msra.gmra.mrb[4].mxu0 %v5489_v51 }
 0x2a8   : > { %4236 = vmatpush3.bf16.msra.mxu0 %v4235_v18  ;;  %4052 = vmatprep.mubr.msk.f32.mxu0 %vm4852_vm0, %v4853_v1 }
 0x2a9   : > { %4237 = vmatprep.subr.bf16.mxu0 %v4851_v0 }
 0x2ac   : > { %4239 = vmatpush3.bf16.msra.mxu0 %v4238_v19 }
 0x2ad   : > { %4240 = vmatprep.subr.bf16.mxu0 %v4851_v0 }
 0x2af   : > { %4053 = vmatmul.mubr.f32.vlgmr.msra.gmra.mrb[4].mxu0 %v5483_v49 }
 0x2b0   : > { %4242 = vmatpush3.bf16.msra.mxu0 %v4211_v6  ;;  %4063 = vmatprep.mubr.msk.f32.mxu0 %vm4852_vm0, %v4853_v1 }
 0x2b1   : > { %4243 = vmatprep.subr.bf16.mxu0 %v4851_v0 }
 0x2b4   : > { %4245 = vmatpush3.bf16.msra.mxu0 %v4214_v9 }
 0x2b7   : > { %4064 = vmatmul.mubr.f32.vlgmr.msra.gmra.mrb[4].mxu0 %v5483_v49 }
 0x2b8   : > { %4678 = shalt.err (!%p4675_p1)
}
 0x2b9   : > { %s4679_s25 = scalar_lea.hbm %s5594_s4, 128  ;;  %s4683_s9 = scalar_lea.hbm %s5842_s29, 256 }
 0x2ba   : > { %p4680_p6 = scmp.ne.s32.totalorder %s5594_s4, %s4679_s25  ;;  %p4684_p7 = scmp.lt.u32.totalorder %s5594_s4, %s5842_s29 }
 0x2bb   : > { %p4685_p9 = scmp.lt.u32.totalorder %s4683_s9, %s4679_s25  ;;  %p4687_p11 = scmp.lt.u32.totalorder %s4679_s25, %s5594_s4 }
 0x2bc   : > { %p4681_p12 = pnand %p4680_p6, %p5843_p8 }
 0x2bd   : > { %p4686_p3 = por %p4685_p9, %p4684_p7 }
 0x2be   : > { %p4682_p0 = pneg %p4681_p12 }
 0x2bf   : > { %p4688_p13 = por %p4687_p11, %p4686_p3 }
 0x2c1   : > { %p4689_p5 = pnand %p4688_p13, %p4682_p0 }
 0x2c3   : > { %4692 = shalt.err (!%p4689_p5)
}
 0x2c4   : > { %4326 = dma.vmem_to_hbm [thread:$0]  (%p5843_p8), %s3250_s26, 128, %s5594_s4, %s3221_s14   ;;  %v3573_v0 = vld [vmem:[#allocation13] ss:$0 sm:$0xff] }
 0x2c5   : > { %s5844_s30 = sld [smem:[#allocation43_spill]]  ;;  %s692_s21 = scalar_lea.vmem [#allocation17], %s5255_s24 }
 0x2c6   : > { %s3262_s3 = sshll.u32 %s692_s21, 4  ;;  %s699_s20 = scalar_lea.vmem [#allocation19], %s5255_s24  ;;  %s5627_s3 = int_to_ptr.vmem [resolvable:$true] %s3262_s3 }
 0x2c7   : > { %s3275_s12 = sshll.u32 %s699_s20, 4  ;;  %s5845_s4 = sld [smem:[#allocation46_spill]]  ;;  %s5635_s12 = int_to_ptr.vmem [resolvable:$true] %s3275_s12 }
 0x2c8   : > { %s5846_s9 = sld [smem:[#allocation47_spill]]  ;;  %s5641_s1 = scalar_lea.sflag [#allocation18], %s600_s28 }
 0x2c9   : > { %s4693_s13 = scalar_lea.vmem %s5627_s3, 128  ;;  %s4855_s19 = smov [#allocation17]  }
 0x2ca   : > { %p4694_p2 = scmp.ne.s32.totalorder %s5627_s3, %s4693_s13 }
 0x2cb   : > { %v3574_v1 = vld [vmem:[%s5844_s30] ss:$0 sm:$0xff]  ;;  %s4697_s30 = sshll.u32 %s4855_s19, 4  ;;  %s4698_s30 = int_to_ptr.vmem [resolvable:$false] %s4697_s30 }
 0x2cc   : > { %p4695_p4 = pnand %p4694_p2, %p5843_p8  ;;  %s4699_s25 = scalar_lea.vmem %s4698_s30, 256 }
 0x2cd   : > { %s5625_s26 = scalar_lea.hbm %s5845_s4, %s5588_s15  ;;  %p4700_p1 = scmp.lt.s32.totalorder %s5627_s3, %s4698_s30 }
 0x2ce   : > { %s5633_s17 = scalar_lea.hbm %s5846_s9, %s5588_s15  ;;  %p4696_p10 = pneg %p4695_p4 }
 0x2cf   : > { %p4701_p6 = scmp.lt.s32.totalorder %s4699_s25, %s4693_s13 }
 0x2d1   : > { %p4702_p12 = por %p4701_p6, %p4700_p1 }
 0x2d3   : > { %p4703_p0 = pnand %p4702_p12, %p4696_p10 }
 0x35a   : > { %v2221_v20 = vpop.f32.mrb[2].mxu0  ;;  %v2718_v21 = vpop.f32.mrb[4].mxu1 }
 0x35b   : > { %v4249_v22 = vadd.f32 %v3573_v0, %v2221_v20  ;;  %v4250_v23 = vadd.f32 %v3574_v1, %v2718_v21  ;;  %v3933_v24 = vpop.f32.mrb[3].mxu0  ;;  %v3999_v25 = vpop.f32.mrb[5].mxu1 }
 0x35d   : > { %2225 = vst.msk [vmem:[%s692_s21] sm:$0xff] %vm719_vm1, %v4249_v22  ;;  %2722 = vst.msk [vmem:[%s699_s20] sm:$0xff] %vm719_vm1, %v4250_v23 }
 0x35e   : > { %4706 = shalt.err (!%p4703_p0)
}
 0x35f   : > { %s4707_s27 = scalar_lea.hbm %s5625_s26, 128  ;;  %s4711_s20 = scalar_lea.hbm %s5845_s4, 256 }
 0x360   : > { %p4708_p7 = scmp.ne.s32.totalorder %s5625_s26, %s4707_s27  ;;  %p4712_p11 = scmp.lt.u32.totalorder %s5625_s26, %s5845_s4 }
 0x361   : > { %p4713_p13 = scmp.lt.u32.totalorder %s4711_s20, %s4707_s27  ;;  %p4715_p2 = scmp.lt.u32.totalorder %s4707_s27, %s5625_s26 }
 0x362   : > { %p4709_p9 = pnand %p4708_p7, %p5843_p8 }
 0x363   : > { %p4714_p5 = por %p4713_p13, %p4712_p11 }
 0x364   : > { %p4710_p3 = pneg %p4709_p9 }
 0x365   : > { %p4716_p4 = por %p4715_p2, %p4714_p5 }
 0x367   : > { %p4717_p10 = pnand %p4716_p4, %p4710_p3 }
 0x369   : > { %4720 = shalt.err (!%p4717_p10)
}
 0x36a   : > { %4327 = dma.vmem_to_hbm [thread:$0]  (%p5843_p8), %s5627_s3, 128, %s5625_s26, %s5641_s1  }
 0x36b   : > { %s4721_s10 = scalar_lea.vmem %s5635_s12, 128  ;;  %s4856_s13 = smov [#allocation19]  }
 0x36c   : > { %p4722_p1 = scmp.ne.s32.totalorder %s5635_s12, %s4721_s10  ;;  %s4725_s19 = sshll.u32 %s4856_s13, 4  ;;  %s4726_s19 = int_to_ptr.vmem [resolvable:$false] %s4725_s19 }
 0x36d   : > { %s4727_s30 = scalar_lea.vmem %s4726_s19, 256  ;;  %p4728_p0 = scmp.lt.s32.totalorder %s5635_s12, %s4726_s19 }
 0x36e   : > { %p4723_p6 = pnand %p4722_p1, %p5843_p8  ;;  %p4729_p7 = scmp.lt.s32.totalorder %s4727_s30, %s4721_s10 }
 0x370   : > { %p4724_p12 = pneg %p4723_p6  ;;  %p4730_p9 = por %p4729_p7, %p4728_p0 }
 0x372   : > { %p4731_p3 = pnand %p4730_p9, %p4724_p12 }
 0x374   : > { %4734 = shalt.err (!%p4731_p3)
}
 0x375   : > { %s4735_s3 = scalar_lea.hbm %s5633_s17, 128  ;;  %s4739_s27 = scalar_lea.hbm %s5846_s9, 256 }
 0x376   : > { %p4736_p11 = scmp.ne.s32.totalorder %s5633_s17, %s4735_s3  ;;  %p4740_p2 = scmp.lt.u32.totalorder %s5633_s17, %s5846_s9 }
 0x377   : > { %p4741_p4 = scmp.lt.u32.totalorder %s4739_s27, %s4735_s3  ;;  %p4743_p1 = scmp.lt.u32.totalorder %s4735_s3, %s5633_s17 }
 0x378   : > { %p4737_p13 = pnand %p4736_p11, %p5843_p8 }
 0x379   : > { %p4742_p10 = por %p4741_p4, %p4740_p2 }
 0x37a   : > { %p4738_p5 = pneg %p4737_p13 }
 0x37b   : > { %p4744_p6 = por %p4743_p1, %p4742_p10 }
 0x37d   : > { %p4745_p12 = pnand %p4744_p6, %p4738_p5 }
 0x37f   : > { %4748 = shalt.err (!%p4745_p12)
}
 0x380   : > { %4328 = dma.vmem_to_hbm [thread:$0]  (%p5843_p8), %s5635_s12, 128, %s5633_s17, %s5641_s1  }
 0x381   : > { %s5847_s14 = sld [smem:[#allocation44_spill]]  ;;  %s706_s10 = scalar_lea.vmem [#allocation20], %s5255_s24 }
 0x382   : > { %s3288_s13 = sshll.u32 %s706_s10, 4  ;;  %s5848_s3 = sld [smem:[#allocation48_spill]]  ;;  %s5697_s13 = int_to_ptr.vmem [resolvable:$true] %s3288_s13 }
 0x383   : > { %s3236_s12 = scalar_lea.sflag [#allocation21], %s5252_s18  ;;  %s4749_s17 = scalar_lea.vmem %s5697_s13, 128 }
 0x384   : > { %p4750_p0 = scmp.ne.s32.totalorder %s5697_s13, %s4749_s17  ;;  %s4857_s24 = smov [#allocation20]  }
 0x385   : > { %s4753_s1 = sshll.u32 %s4857_s24, 4  ;;  %s4754_s1 = int_to_ptr.vmem [resolvable:$false] %s4753_s1 }
 0x386   : > { %p4751_p7 = pnand %p4750_p0, %p5843_p8  ;;  %s4755_s25 = scalar_lea.vmem %s4754_s1, 256 }
 0x387   : > { %v3575_v27 = vld [vmem:[%s5847_s14] ss:$0 sm:$0xff]  ;;  %p4756_p3 = scmp.lt.s32.totalorder %s5697_s13, %s4754_s1  ;;  %p4757_p11 = scmp.lt.s32.totalorder %s4755_s25, %s4749_s17 }
 0x388   : > { %s5695_s26 = scalar_lea.hbm %s5848_s3, %s5588_s15  ;;  %p4752_p9 = pneg %p4751_p7 }
 0x389   : > { %p4758_p13 = por %p4757_p11, %p4756_p3 }
 0x38a   : > { %v3215_v28 = vpop.f32.mrb[4].mxu0 }
 0x38b   : > { %v4251_v30 = vadd.f32 %v3575_v27, %v3215_v28  ;;  %v4065_v31 = vpop.f32.mrb[5].mxu0  ;;  %p4759_p5 = pnand %p4758_p13, %p4752_p9 }
 0x38d   : > { %3219 = vst.msk [vmem:[%s706_s10] sm:$0xff] %vm719_vm1, %v4251_v30 }
 0x38e   : > { %4762 = shalt.err (!%p4759_p5)
}
 0x38f   : > { %s4763_s18 = scalar_lea.hbm %s5695_s26, 128  ;;  %s4767_s28 = scalar_lea.hbm %s5848_s3, 256 }
 0x390   : > { %p4764_p2 = scmp.ne.s32.totalorder %s5695_s26, %s4763_s18  ;;  %p4768_p1 = scmp.lt.u32.totalorder %s5695_s26, %s5848_s3 }
 0x391   : > { %p4769_p6 = scmp.lt.u32.totalorder %s4767_s28, %s4763_s18  ;;  %p4771_p0 = scmp.lt.u32.totalorder %s4763_s18, %s5695_s26 }
 0x392   : > { %p4765_p4 = pnand %p4764_p2, %p5843_p8 }
 0x393   : > { %p4770_p12 = por %p4769_p6, %p4768_p1 }
 0x394   : > { %p4766_p10 = pneg %p4765_p4 }
 0x395   : > { %p4772_p7 = por %p4771_p0, %p4770_p12 }
 0x397   : > { %p4773_p9 = pnand %p4772_p7, %p4766_p10 }
 0x399   : > { %4776 = shalt.err (!%p4773_p9)
}
 0x39a   : > { %4329 = dma.vmem_to_hbm [thread:$0]  (%p5843_p8), %s5697_s13, 128, %s5695_s26, %s3236_s12  }
 0x39b PF: > { %s5849_s7 = sld [smem:[#allocation30_spill]]  ;;  %s5850_s14 = sld [smem:[#allocation35_spill]] }
 0x39c   : > { %s5851_s10 = sld [smem:[#allocation31_spill]] }
 0x3a1   : > { %s3300_s19 = sand.u32 1, %s5849_s7   ;;  %p5852_p3 = scmp.ne.s32.totalorder %s5850_s14, 0 }
 0x3a2   : > { %p5853_p11 = scmp.ge.s32.totalorder %s5851_s10, 2  ;;  %s3301_s30 = scalar_lea.sflag [#allocation4], %s3300_s19 }
 0x3a4   : > { %p4361_p13 = pnand %p5853_p11, %p5852_p3 }
 0x3a6   : > { %4814 = dma.done.wait (!%p4361_p13), %s3301_s30, 128  }
 0x3a7   : > { %4816 = vsyncadd (!%p4361_p13), %s3301_s30, 4294967168  ;;  %s5854_s17 = sadd.s32 4294967294, %s5851_s10  }
 0x3a8   : > { %s3309_s24 = sand.u32 1, %s5854_s17  }
 0x3a9   : > { %s3310_s1 = scalar_lea.sflag [#allocation18], %s3309_s24 }
 0x3aa   : > { %4818 = dma.done.wait (!%p4361_p13), %s3310_s1, 256  }
 0x3ab   : > { %4820 = vsyncadd (!%p4361_p13), %s3310_s1, 4294967040  ;;  %s3328_s16 = scalar_lea.sflag [#allocation21], %s3300_s19 }
 0x3ac   : > { %4822 = dma.done.wait (!%p4361_p13), %s3328_s16, 128  }
 0x3ad   : > { %4824 = vsyncadd (!%p4361_p13), %s3328_s16, 4294967168  ;;  %s5855_s24 = sld [smem:[#allocation32_spill]]  ;;  %s5856_s13 = sld [smem:[#allocation33_spill]] }
 0x3ae   : > { %s5857_s21 = smov %s4831_s22  ;;  %s5858_s22 = smov %s4835_s23 }
 0x3b3   : > { %p42_p8 = scmp.ge.s32.totalorder %s5855_s24, 4   ;;  %s5859_s23 = smov %s5856_s13 }
 0x3b5   :  { %44 = sbr.rel (!%p42_p8) target bundleno = 28 (0x1c), region = 210 }
 0x3bc   :  { %3333 = vsyncpa [#allocation3], 1 }
 0x3bd   :  { %3335 = vsyncpa [#allocation3 + $0x1], 1 }
 0x3be   :  { %3336 = vsyncpa [#allocation6], 1 }
 0x3bf   :  { %3338 = vsyncpa [#allocation6 + $0x1], 1 }
 0x3c0   :  { %3339 = vsyncpa [#allocation9], 1 }
 0x3c1   :  { %3340 = vsyncpa [#allocation12], 1 }
 0x3c2   :  { %3341 = vsyncpa [#allocation15], 1 }
 0x3c3   :  { %3342 = vsyncpa [#allocation4], 1 }
 0x3c4   :  { %3344 = vsyncpa [#allocation4 + $0x1], 1 }
 0x3c5   :  { %3345 = vsyncpa [#allocation18], 1 }
 0x3c6   :  { %3347 = vsyncpa [#allocation18 + $0x1], 1 }
 0x3c7   :  { %3348 = vsyncpa [#allocation21], 1 }
 0x3c8   :  { %3350 = vsyncpa [#allocation21 + $0x1], 1 }

</bundles_post_ra>
